<compile_context>
chip_gen: v7x
topology: tpu7x:2x2x1
jax: 0.10.0
libtpu: 0.0.40
codegen_flags: <defaults>
</compile_context>

<pallas_src>
import math

import jax
import jax.numpy as jnp
from jax.experimental import pallas as pl
from jax.experimental.pallas import tpu as pltpu

GROUPS = 32  # nn.GroupNorm(32, in_ch)


# ----------------------------------------------------------------------------
# Fused Pallas kernel: one batch tile (Bb images) per grid step.
# ----------------------------------------------------------------------------
def _attn_block_kernel(x_ref, gamma_ref, beta_ref, pmat_ref,
                       wqkv_ref, bqkv_ref, wp_ref, bp_ref, o_ref):
    x = x_ref[...]                                                      # [Bb, N, C] f32
    Bb, N, C = x.shape
    M = Bb * N

    # ---- GroupNorm(32, C): two-pass stats via a CxC block-averaging matmul ----
    # pmat = one_hot(group) @ one_hot(group).T / (N * C_per_group)
    csum = jnp.sum(x, axis=1)                                           # [Bb, C]
    mean_c = jnp.dot(csum, pmat_ref[...],
                     preferred_element_type=jnp.float32)                # per-group mean, [Bb, C]
    d = x - mean_c[:, None, :]                                          # [Bb, N, C]
    dsq = jnp.sum(d * d, axis=1)                                        # [Bb, C]
    var_c = jnp.dot(dsq, pmat_ref[...],
                    preferred_element_type=jnp.float32)                 # per-group var, [Bb, C]
    inv_c = jax.lax.rsqrt(var_c + 1e-5)
    h = d * inv_c[:, None, :] * gamma_ref[...] + beta_ref[...]          # [Bb, N, C] f32

    # ---- fused q/k/v projection: one (M, C) @ (C, 3C) bf16 GEMM, f32 accumulation ----
    hb = h.reshape(M, C).astype(jnp.bfloat16)
    qkv = jnp.dot(hb, wqkv_ref[...],
                  preferred_element_type=jnp.float32) + bqkv_ref[...]   # [M, 3C]
    # 1/sqrt(C) is pre-folded into the q columns of wqkv/bqkv in the wrapper.
    q = qkv[:, 0 * C:1 * C].reshape(Bb, N, C).astype(jnp.bfloat16)
    k = qkv[:, 1 * C:2 * C].reshape(Bb, N, C).astype(jnp.bfloat16)
    v = qkv[:, 2 * C:3 * C].reshape(Bb, N, C).astype(jnp.bfloat16)

    # ---- dot-product attention over the N = H*W spatial positions (per image) ----
    # TODO(synk): for real resolutions (N >= ~1024) replace the dense [N, N] score matrix
    # with a KV-tiled online-softmax (flash) loop; at demo sizes everything fits in VMEM.
    s = jnp.einsum('bnc,bmc->bnm', q, k,
                   preferred_element_type=jnp.float32)                  # [Bb, N, N] f32
    s_max = jnp.max(s, axis=-1, keepdims=True)
    p = jnp.exp(s - s_max)                                              # unnormalised softmax
    l = jnp.sum(p, axis=-1, keepdims=True)                              # [Bb, N, 1]
    a = jnp.einsum('bnm,bmc->bnc', p.astype(jnp.bfloat16), v,
                   preferred_element_type=jnp.float32)                  # [Bb, N, C]
    a = a * pl.reciprocal(l, approx=True)                               # normalise on [N, C]

    # ---- output 1x1 projection + residual ----
    out = jnp.dot(a.reshape(M, C).astype(jnp.bfloat16), wp_ref[...],
                  preferred_element_type=jnp.float32) + bp_ref[...]     # [M, C]
    o_ref[...] = (x + out.reshape(Bb, N, C)).astype(o_ref.dtype)


# ----------------------------------------------------------------------------
# Wrapper: NCHW <-> [B, N, C] plumbing, weight fusion, pallas_call.
# ----------------------------------------------------------------------------
def attn_block(x_nchw, params, *, block_batch=None):
    B, C, H, W = x_nchw.shape
    assert C % GROUPS == 0
    N = H * W
    Cg = C // GROUPS

    # Batch elements per grid step: aim for >= 256 GEMM rows (fills a 256-row MXU);
    # for small problems fall back to the whole batch in one step.
    if block_batch is None:
        block_batch = B
        for bb in range(1, B + 1):
            if B % bb == 0 and bb * N >= 256:
                block_batch = bb
                break
    assert B % block_batch == 0
    Bb = block_batch

    # Channels on the lane axis (C multiple of 128 -> lane-dense loads/stores).
    # NOTE: in a full NHWC model this transpose pair should be folded into adjacent ops.
    x_bnc = jnp.transpose(x_nchw, (0, 2, 3, 1)).reshape(B, N, C)

    # CxC block-averaging matrix: (row_sums @ pmat)[c] = mean over the group containing c.
    gidx = jnp.arange(C, dtype=jnp.int32) // Cg
    ga = jax.nn.one_hot(gidx, GROUPS, dtype=jnp.float32)                # [C, G]
    pmat = (ga @ ga.T) * (1.0 / float(N * Cg))                          # [C, C]

    scale = 1.0 / math.sqrt(C)
    # Fused qkv weight (C, 3C) in bf16 for the MXU; attention scale folded into q columns.
    wqkv = jnp.concatenate([params.wq * scale, params.wk, params.wv],
                           axis=1).astype(jnp.bfloat16)                 # [C, 3C] bf16
    bqkv = jnp.concatenate([params.bq * scale, params.bk, params.bv]).reshape(1, 3 * C)
    wp = params.wp.astype(jnp.bfloat16)                                 # [C, C] bf16
    bp2d = params.bp.reshape(1, C)
    gamma2d = params.gamma.reshape(1, C)
    beta2d = params.beta.reshape(1, C)

    def resident(shape):  # whole array, same block every grid step (stays VMEM-resident)
        return pl.BlockSpec(shape, lambda b: tuple(0 for _ in shape))

    out_bnc = pl.pallas_call(
        _attn_block_kernel,
        out_shape=jax.ShapeDtypeStruct((B, N, C), jnp.float32),
        grid_spec=pltpu.PrefetchScalarGridSpec(
            num_scalar_prefetch=0,
            grid=(B // Bb,),
            in_specs=[
                pl.BlockSpec((Bb, N, C), lambda b: (b, 0, 0)),   # x
                resident((1, C)),                                # gamma
                resident((1, C)),                                # beta
                resident((C, C)),                                # group-averaging matrix
                resident((C, 3 * C)),                            # fused wqkv (bf16)
                resident((1, 3 * C)),                            # fused bqkv (f32)
                resident((C, C)),                                # wp (bf16)
                resident((1, C)),                                # bp (f32)
            ],
            out_specs=pl.BlockSpec((Bb, N, C), lambda b: (b, 0, 0)),
        ),
        compiler_params=pltpu.CompilerParams(
            dimension_semantics=("parallel",)),
    )(x_bnc, gamma2d, beta2d, pmat, wqkv, bqkv, wp, bp2d)

    return jnp.transpose(out_bnc.reshape(B, H, W, C), (0, 3, 1, 2))


# ----------------------------------------------------------------------------
# Parameter construction (mirrors the PyTorch __init__ / initialize()).
# ----------------------------------------------------------------------------
def xavier_uniform(key, fan_in, fan_out, gain=1.0):
    bound = gain * math.sqrt(6.0 / (fan_in + fan_out))
    # stored as (in, out) so forward is h @ W
    return jax.random.uniform(key, (fan_in, fan_out), jnp.float32, -bound, bound)


class AttnBlockParams:
    def __init__(self, key, in_ch):
        kq, kk, kv, kp = jax.random.split(key, 4)
        self.gamma = jnp.ones((in_ch,), jnp.float32)        # GroupNorm affine
        self.beta = jnp.zeros((in_ch,), jnp.float32)
        self.wq = xavier_uniform(kq, in_ch, in_ch)
        self.bq = jnp.zeros((in_ch,), jnp.float32)
        self.wk = xavier_uniform(kk, in_ch, in_ch)
        self.bk = jnp.zeros((in_ch,), jnp.float32)
        self.wv = xavier_uniform(kv, in_ch, in_ch)
        self.bv = jnp.zeros((in_ch,), jnp.float32)
        self.wp = xavier_uniform(kp, in_ch, in_ch, gain=1e-5)    # proj: gain=1e-5
        self.bp = jnp.zeros((in_ch,), jnp.float32)


# ----------------------------------------------------------------------------
# Pure-JAX f32 reference for correctness check.
# ----------------------------------------------------------------------------
def attn_block_reference(params, x):
    B, C, H, W = x.shape
    xg = x.reshape(B, GROUPS, C // GROUPS, H, W)
    mean = xg.mean(axis=(2, 3, 4), keepdims=True)
    var = xg.var(axis=(2, 3, 4), keepdims=True)
    hn = ((xg - mean) / jnp.sqrt(var + 1e-5)).reshape(B, C, H, W)
    hn = hn * params.gamma.reshape(1, C, 1, 1) + params.beta.reshape(1, C, 1, 1)
    h = jnp.transpose(hn, (0, 2, 3, 1)).reshape(B, H * W, C)
    q = h @ params.wq + params.bq
    k = h @ params.wk + params.bk
    v = h @ params.wv + params.bv
    w = jnp.einsum('bnc,bmc->bnm', q, k) * (C ** -0.5)
    w = jax.nn.softmax(w, axis=-1)
    a = jnp.einsum('bnm,bmc->bnc', w, v)
    out = a @ params.wp + params.bp
    out = jnp.transpose(out.reshape(B, H, W, C), (0, 3, 1, 2))
    return x + out


if __name__ == "__main__":
    # GroupNorm(32, C) requires C % 32 == 0; C=128 keeps the channel/lane axis dense.
    B, C, H, W = 2, 128, 8, 8

    key = jax.random.PRNGKey(0)
    pkey, xkey = jax.random.split(key)
    params = AttnBlockParams(pkey, C)
    x = jax.random.normal(xkey, (B, C, H, W), jnp.float32)

    out = attn_block(x, params)
    out = jax.block_until_ready(out)

    ref = attn_block_reference(params, x)
    assert out.shape == (B, C, H, W)
    # bf16 MXU operands + approximate reciprocal in the kernel -> loosen the tolerance
    # vs. the pure-f32 reference (accumulation stays f32, so error remains small).
    err = float(jnp.max(jnp.abs(out - ref)))
    assert jnp.allclose(out, ref, atol=5e-3, rtol=5e-3), err

    print("KERNEL_OK")
</pallas_src>

<mosaic_0001>
module attributes {stable_mosaic.version = 11 : i64} {
  func.func @_attn_block_kernel(%arg0: i32, %arg1: memref<2x64x128xf32, #tpu.memory_space<vmem>>, %arg2: memref<1x128xf32, #tpu.memory_space<vmem>>, %arg3: memref<1x128xf32, #tpu.memory_space<vmem>>, %arg4: memref<128x128xf32, #tpu.memory_space<vmem>>, %arg5: memref<128x384xbf16, #tpu.memory_space<vmem>>, %arg6: memref<1x384xf32, #tpu.memory_space<vmem>>, %arg7: memref<128x128xbf16, #tpu.memory_space<vmem>>, %arg8: memref<1x128xf32, #tpu.memory_space<vmem>>, %arg9: memref<2x64x128xf32, #tpu.memory_space<vmem>>) attributes {dimension_semantics = [#tpu.dimension_semantics<parallel>], iteration_bounds = array<i64: 1>, scalar_prefetch = 0 : i64, scratch_operands = 0 : i64, tpu.core_type = #tpu.core_type<tc>, window_params = [{transform_indices = @transform_0, window_bounds = array<i64: 2, 64, 128>}, {pipeline_mode = #tpu.pipeline_mode<synchronous>, transform_indices = @transform_1, window_bounds = array<i64: 1, 128>}, {pipeline_mode = #tpu.pipeline_mode<synchronous>, transform_indices = @transform_2, window_bounds = array<i64: 1, 128>}, {pipeline_mode = #tpu.pipeline_mode<synchronous>, transform_indices = @transform_3, window_bounds = array<i64: 128, 128>}, {pipeline_mode = #tpu.pipeline_mode<synchronous>, transform_indices = @transform_4, window_bounds = array<i64: 128, 384>}, {pipeline_mode = #tpu.pipeline_mode<synchronous>, transform_indices = @transform_5, window_bounds = array<i64: 1, 384>}, {pipeline_mode = #tpu.pipeline_mode<synchronous>, transform_indices = @transform_6, window_bounds = array<i64: 128, 128>}, {pipeline_mode = #tpu.pipeline_mode<synchronous>, transform_indices = @transform_7, window_bounds = array<i64: 1, 128>}, {transform_indices = @transform_8, window_bounds = array<i64: 2, 64, 128>}]} {
    %c0 = arith.constant 0 : index
    %c0_0 = arith.constant 0 : index
    %c0_1 = arith.constant 0 : index
    %0 = vector.load %arg1[%c0, %c0_0, %c0_1] : memref<2x64x128xf32, #tpu.memory_space<vmem>>, vector<2x64x128xf32>
    %cst = arith.constant dense<0.000000e+00> : vector<2x128xf32>
    %1 = vector.multi_reduction <add>, %0, %cst [1] : vector<2x64x128xf32> to vector<2x128xf32>
    %c0_2 = arith.constant 0 : index
    %c0_3 = arith.constant 0 : index
    %2 = vector.load %arg4[%c0_2, %c0_3] : memref<128x128xf32, #tpu.memory_space<vmem>>, vector<128x128xf32>
    %cst_4 = arith.constant dense<0.000000e+00> : vector<2x128xf32>
    %3 = tpu.matmul %1, %2, %cst_4 {dimension_numbers = #tpu.dot_dimension_numbers<[1], [0], [0], [1], [0, 0, 1, 1], [], []>} : vector<2x128xf32>, vector<128x128xf32>, vector<2x128xf32> -> vector<2x128xf32>
    %4 = vector.shape_cast %3 : vector<2x128xf32> to vector<2x1x128xf32>
    %5 = vector.broadcast %4 : vector<2x1x128xf32> to vector<2x64x128xf32>
    %6 = arith.subf %0, %5 : vector<2x64x128xf32>
    %7 = arith.mulf %6, %6 : vector<2x64x128xf32>
    %cst_5 = arith.constant dense<0.000000e+00> : vector<2x128xf32>
    %8 = vector.multi_reduction <add>, %7, %cst_5 [1] : vector<2x64x128xf32> to vector<2x128xf32>
    %c0_6 = arith.constant 0 : index
    %c0_7 = arith.constant 0 : index
    %9 = vector.load %arg4[%c0_6, %c0_7] : memref<128x128xf32, #tpu.memory_space<vmem>>, vector<128x128xf32>
    %cst_8 = arith.constant dense<0.000000e+00> : vector<2x128xf32>
    %10 = tpu.matmul %8, %9, %cst_8 {dimension_numbers = #tpu.dot_dimension_numbers<[1], [0], [0], [1], [0, 0, 1, 1], [], []>} : vector<2x128xf32>, vector<128x128xf32>, vector<2x128xf32> -> vector<2x128xf32>
    %cst_9 = arith.constant 9.99999974E-6 : f32
    %11 = vector.broadcast %cst_9 : f32 to vector<2x128xf32>
    %12 = arith.addf %10, %11 : vector<2x128xf32>
    %13 = math.rsqrt %12 : vector<2x128xf32>
    %14 = vector.shape_cast %13 : vector<2x128xf32> to vector<2x1x128xf32>
    %15 = vector.broadcast %14 : vector<2x1x128xf32> to vector<2x64x128xf32>
    %16 = arith.mulf %6, %15 : vector<2x64x128xf32>
    %c0_10 = arith.constant 0 : index
    %c0_11 = arith.constant 0 : index
    %17 = vector.load %arg2[%c0_10, %c0_11] : memref<1x128xf32, #tpu.memory_space<vmem>>, vector<1x128xf32>
    %18 = vector.shape_cast %17 : vector<1x128xf32> to vector<1x1x128xf32>
    %19 = vector.broadcast %18 : vector<1x1x128xf32> to vector<2x64x128xf32>
    %20 = arith.mulf %16, %19 : vector<2x64x128xf32>
    %c0_12 = arith.constant 0 : index
    %c0_13 = arith.constant 0 : index
    %21 = vector.load %arg3[%c0_12, %c0_13] : memref<1x128xf32, #tpu.memory_space<vmem>>, vector<1x128xf32>
    %22 = vector.shape_cast %21 : vector<1x128xf32> to vector<1x1x128xf32>
    %23 = vector.broadcast %22 : vector<1x1x128xf32> to vector<2x64x128xf32>
    %24 = arith.addf %20, %23 : vector<2x64x128xf32>
    %25 = vector.shape_cast %24 : vector<2x64x128xf32> to vector<128x128xf32>
    %26 = arith.truncf %25 : vector<128x128xf32> to vector<128x128xbf16>
    %c0_14 = arith.constant 0 : index
    %c0_15 = arith.constant 0 : index
    %27 = vector.load %arg5[%c0_14, %c0_15] : memref<128x384xbf16, #tpu.memory_space<vmem>>, vector<128x384xbf16>
    %cst_16 = arith.constant dense<0.000000e+00> : vector<128x384xf32>
    %28 = tpu.matmul %26, %27, %cst_16 {dimension_numbers = #tpu.dot_dimension_numbers<[1], [0], [0], [1], [0, 0, 1, 1], [], []>} : vector<128x128xbf16>, vector<128x384xbf16>, vector<128x384xf32> -> vector<128x384xf32>
    %c0_17 = arith.constant 0 : index
    %c0_18 = arith.constant 0 : index
    %29 = vector.load %arg6[%c0_17, %c0_18] : memref<1x384xf32, #tpu.memory_space<vmem>>, vector<1x384xf32>
    %30 = vector.broadcast %29 : vector<1x384xf32> to vector<128x384xf32>
    %31 = arith.addf %28, %30 : vector<128x384xf32>
    %32 = vector.extract_strided_slice %31 {offsets = [0, 0], sizes = [128, 128], strides = [1, 1]} : vector<128x384xf32> to vector<128x128xf32>
    %33 = vector.shape_cast %32 : vector<128x128xf32> to vector<2x64x128xf32>
    %34 = arith.truncf %33 : vector<2x64x128xf32> to vector<2x64x128xbf16>
    %35 = vector.extract_strided_slice %31 {offsets = [0, 128], sizes = [128, 128], strides = [1, 1]} : vector<128x384xf32> to vector<128x128xf32>
    %36 = vector.shape_cast %35 : vector<128x128xf32> to vector<2x64x128xf32>
    %37 = arith.truncf %36 : vector<2x64x128xf32> to vector<2x64x128xbf16>
    %38 = vector.extract_strided_slice %31 {offsets = [0, 256], sizes = [128, 128], strides = [1, 1]} : vector<128x384xf32> to vector<128x128xf32>
    %39 = vector.shape_cast %38 : vector<128x128xf32> to vector<2x64x128xf32>
    %40 = arith.truncf %39 : vector<2x64x128xf32> to vector<2x64x128xbf16>
    "tpu.trace_start"() <{level = 10 : i32, message = "bnc,bmc->bnm"}> : () -> ()
    %cst_19 = arith.constant dense<0.000000e+00> : vector<2x64x64xf32>
    %41 = tpu.matmul %34, %37, %cst_19 {dimension_numbers = #tpu.dot_dimension_numbers<[2], [2], [1], [1], [0, 0, 0, 1, 1, 1], [0], [0]>} : vector<2x64x128xbf16>, vector<2x64x128xbf16>, vector<2x64x64xf32> -> vector<2x64x64xf32>
    "tpu.trace_stop"() : () -> ()
    %cst_20 = arith.constant dense<0xFF800000> : vector<2x64xf32>
    %42 = vector.multi_reduction <maximumf>, %41, %cst_20 [2] : vector<2x64x64xf32> to vector<2x64xf32>
    %43 = vector.shape_cast %42 : vector<2x64xf32> to vector<2x64x1xf32>
    %44 = vector.broadcast %43 : vector<2x64x1xf32> to vector<2x64x64xf32>
    %45 = arith.subf %41, %44 : vector<2x64x64xf32>
    %46 = math.exp %45 : vector<2x64x64xf32>
    %cst_21 = arith.constant dense<0.000000e+00> : vector<2x64xf32>
    %47 = vector.multi_reduction <add>, %46, %cst_21 [2] : vector<2x64x64xf32> to vector<2x64xf32>
    %48 = vector.shape_cast %47 : vector<2x64xf32> to vector<2x64x1xf32>
    %49 = arith.truncf %46 : vector<2x64x64xf32> to vector<2x64x64xbf16>
    "tpu.trace_start"() <{level = 10 : i32, message = "bnm,bmc->bnc"}> : () -> ()
    %cst_22 = arith.constant dense<0.000000e+00> : vector<2x64x128xf32>
    %50 = tpu.matmul %49, %40, %cst_22 {dimension_numbers = #tpu.dot_dimension_numbers<[2], [1], [1], [2], [0, 0, 0, 1, 1, 2], [0], [0]>} : vector<2x64x64xbf16>, vector<2x64x128xbf16>, vector<2x64x128xf32> -> vector<2x64x128xf32>
    "tpu.trace_stop"() : () -> ()
    %51 = tpu.reciprocal %48 {approx = true} : vector<2x64x1xf32> -> vector<2x64x1xf32>
    %52 = vector.broadcast %51 : vector<2x64x1xf32> to vector<2x64x128xf32>
    %53 = arith.mulf %50, %52 : vector<2x64x128xf32>
    %54 = vector.shape_cast %53 : vector<2x64x128xf32> to vector<128x128xf32>
    %55 = arith.truncf %54 : vector<128x128xf32> to vector<128x128xbf16>
    %c0_23 = arith.constant 0 : index
    %c0_24 = arith.constant 0 : index
    %56 = vector.load %arg7[%c0_23, %c0_24] : memref<128x128xbf16, #tpu.memory_space<vmem>>, vector<128x128xbf16>
    %cst_25 = arith.constant dense<0.000000e+00> : vector<128x128xf32>
    %57 = tpu.matmul %55, %56, %cst_25 {dimension_numbers = #tpu.dot_dimension_numbers<[1], [0], [0], [1], [0, 0, 1, 1], [], []>} : vector<128x128xbf16>, vector<128x128xbf16>, vector<128x128xf32> -> vector<128x128xf32>
    %c0_26 = arith.constant 0 : index
    %c0_27 = arith.constant 0 : index
    %58 = vector.load %arg8[%c0_26, %c0_27] : memref<1x128xf32, #tpu.memory_space<vmem>>, vector<1x128xf32>
    %59 = vector.broadcast %58 : vector<1x128xf32> to vector<128x128xf32>
    %60 = arith.addf %57, %59 : vector<128x128xf32>
    %61 = vector.shape_cast %60 : vector<128x128xf32> to vector<2x64x128xf32>
    %62 = arith.addf %0, %61 : vector<2x64x128xf32>
    %c0_28 = arith.constant 0 : index
    %c0_29 = arith.constant 0 : index
    %c0_30 = arith.constant 0 : index
    %63 = vector.load %arg9[%c0_28, %c0_29, %c0_30] : memref<2x64x128xf32, #tpu.memory_space<vmem>>, vector<2x64x128xf32>
    tpu.vector_store %arg9[%c0_28, %c0_29, %c0_30], %62 {strides = array<i32>} : memref<2x64x128xf32, #tpu.memory_space<vmem>>, vector<2x64x128xf32>,
    return
  }
  func.func @transform_0(%arg0: i32) -> (i32, i32, i32) {
    %c0_i32 = arith.constant 0 : i32
    %c0_i32_0 = arith.constant 0 : i32
    %c0_i32_1 = arith.constant 0 : i32
    return %arg0, %c0_i32, %c0_i32_0 : i32, i32, i32
  }
  func.func @transform_1(%arg0: i32) -> (i32, i32) {
    %c0_i32 = arith.constant 0 : i32
    %c0_i32_0 = arith.constant 0 : i32
    %c0_i32_1 = arith.constant 0 : i32
    return %c0_i32, %c0_i32_0 : i32, i32
  }
  func.func @transform_2(%arg0: i32) -> (i32, i32) {
    %c0_i32 = arith.constant 0 : i32
    %c0_i32_0 = arith.constant 0 : i32
    %c0_i32_1 = arith.constant 0 : i32
    return %c0_i32, %c0_i32_0 : i32, i32
  }
  func.func @transform_3(%arg0: i32) -> (i32, i32) {
    %c0_i32 = arith.constant 0 : i32
    %c0_i32_0 = arith.constant 0 : i32
    %c0_i32_1 = arith.constant 0 : i32
    return %c0_i32, %c0_i32_0 : i32, i32
  }
  func.func @transform_4(%arg0: i32) -> (i32, i32) {
    %c0_i32 = arith.constant 0 : i32
    %c0_i32_0 = arith.constant 0 : i32
    %c0_i32_1 = arith.constant 0 : i32
    return %c0_i32, %c0_i32_0 : i32, i32
  }
  func.func @transform_5(%arg0: i32) -> (i32, i32) {
    %c0_i32 = arith.constant 0 : i32
    %c0_i32_0 = arith.constant 0 : i32
    %c0_i32_1 = arith.constant 0 : i32
    return %c0_i32, %c0_i32_0 : i32, i32
  }
  func.func @transform_6(%arg0: i32) -> (i32, i32) {
    %c0_i32 = arith.constant 0 : i32
    %c0_i32_0 = arith.constant 0 : i32
    %c0_i32_1 = arith.constant 0 : i32
    return %c0_i32, %c0_i32_0 : i32, i32
  }
  func.func @transform_7(%arg0: i32) -> (i32, i32) {
    %c0_i32 = arith.constant 0 : i32
    %c0_i32_0 = arith.constant 0 : i32
    %c0_i32_1 = arith.constant 0 : i32
    return %c0_i32, %c0_i32_0 : i32, i32
  }
  func.func @transform_8(%arg0: i32) -> (i32, i32, i32) {
    %c0_i32 = arith.constant 0 : i32
    %c0_i32_0 = arith.constant 0 : i32
    %c0_i32_1 = arith.constant 0 : i32
    return %arg0, %c0_i32, %c0_i32_0 : i32, i32, i32
  }
}

</mosaic_0001>

<bundles_post_ra>
// kernel: tpu_custom_call.1
= control target key start
LH: loop header
LB: loop body
LE: loop exit
PB: predicated region body
PF: predicated region fallthrough
CT: control target
= control target key end

     0   :  { %13 = vsyncpa [#allocation3], 0  ;;  %s2827_s0 = inlined_call_operand.hbm [shape: f32[2,64,128], index: 0, kind: input, shape index: {}]   ;;  %s2828_s1 = inlined_call_operand.vmem [shape: f32[1,128], index: 1, kind: input, shape index: {}]   ;;  %s2829_s2 = inlined_call_operand.vmem [shape: f32[1,128], index: 2, kind: input, shape index: {}]   ;;  %s2830_s3 = inlined_call_operand.hbm [shape: f32[128,128], index: 3, kind: input, shape index: {}]   ;;  %s2831_s4 = inlined_call_operand.hbm [shape: bf16[128,384], index: 4, kind: input, shape index: {}]   ;;  %s2832_s5 = inlined_call_operand.vmem [shape: f32[1,384], index: 5, kind: input, shape index: {}]   ;;  %s2833_s6 = inlined_call_operand.hbm [shape: bf16[128,128], index: 6, kind: input, shape index: {}]   ;;  %s2834_s7 = inlined_call_operand.vmem [shape: f32[1,128], index: 7, kind: input, shape index: {}]   ;;  %s2835_s8 = inlined_call_operand.hbm [shape: f32[2,64,128], index: 8, kind: output, shape index: {}]  }
   0x1   :  { %14 = vsyncpa [#allocation6], 0 }
   0x2   :  { %15 = vsyncpa [#allocation9], 0 }
   0x3   :  { %16 = vsyncpa [#allocation4], 0  ;;  %s2238_s27 = smov [#allocation5]   ;;  %s2239_s29 = smov [#allocation2]  }
   0x4   :  { %s38_s28 = sshll.u32 %s2238_s27, 4  ;;  %s22_s30 = sshll.u32 %s2239_s29, 4  ;;  %s39_s28 = int_to_ptr.vmem [resolvable:$true] %s38_s28  ;;  %s2299_s30 = int_to_ptr.vmem [resolvable:$true] %s22_s30 }
   0x5   :  { %s2120_s11 = scalar_lea.hbm %s2830_s3, 2048 }
   0x6   :  { %p2121_p0 = scmp.ne.s32.totalorder %s2830_s3, %s2120_s11  ;;  %p2124_p1 = scmp.lt.u32.totalorder %s2120_s11, %s2830_s3 }
   0x8   :  { %p2126_p2 = pnand %p2124_p1, %p2121_p0 }
   0xa   :  { %2129 = shalt.err (!%p2126_p2)
}
   0xb   :  { %s2130_s16 = scalar_lea.vmem %s39_s28, 2048  ;;  %p2135_p4 = scmp.lt.s32.totalorder %s39_s28, %s39_s28 }
   0xc   :  { %p2131_p3 = scmp.ne.s32.totalorder %s39_s28, %s2130_s16  ;;  %p2136_p5 = scmp.lt.s32.totalorder %s2130_s16, %s2130_s16 }
   0xe   :  { %p2137_p6 = por %p2136_p5, %p2135_p4 }
  0x10   :  { %p2138_p7 = pnand %p2137_p6, %p2131_p3 }
  0x12   :  { %2141 = shalt.err (!%p2138_p7)
}
  0x13   :  { %s2240_s17 = smov 128   ;;  %s2241_s18 = smov 8  }
  0x14   :  { %44 = dma.hbm_to_vmem [thread:$0]  %s2830_s3, 2048, %s39_s28, [#allocation6], %s2240_s17, %s2240_s17, %s2241_s18  }
  0x15   :  { %s2142_s23 = scalar_lea.hbm %s2827_s0, 2048 }
  0x16   :  { %p2143_p8 = scmp.ne.s32.totalorder %s2827_s0, %s2142_s23  ;;  %p2146_p9 = scmp.lt.u32.totalorder %s2142_s23, %s2827_s0 }
  0x18   :  { %p2148_p10 = pnand %p2146_p9, %p2143_p8 }
  0x1a   :  { %2151 = shalt.err (!%p2148_p10)
}
  0x1b   :  { %s2152_s29 = scalar_lea.vmem %s2299_s30, 2048  ;;  %p2157_p12 = scmp.lt.s32.totalorder %s2299_s30, %s2299_s30 }
  0x1c   :  { %p2153_p11 = scmp.ne.s32.totalorder %s2299_s30, %s2152_s29  ;;  %p2158_p13 = scmp.lt.s32.totalorder %s2152_s29, %s2152_s29 }
  0x1e   :  { %p2159_p0 = por %p2158_p13, %p2157_p12 }
  0x20   :  { %p2160_p1 = pnand %p2159_p0, %p2153_p11 }
  0x22   :  { %2163 = shalt.err (!%p2160_p1)
}
  0x23   :  { %28 = dma.hbm_to_vmem [thread:$0]  %s2827_s0, 2048, %s2299_s30, [#allocation3], %s2240_s17, %s2240_s17, %s2241_s18  }
  0x24   :  { %s2242_s9 = smov [#allocation7]   ;;  %s2164_s13 = scalar_lea.hbm %s2831_s4, 3072 }
  0x25   :  { %s50_s10 = sshll.u32 %s2242_s9, 4  ;;  %p2165_p2 = scmp.ne.s32.totalorder %s2831_s4, %s2164_s13  ;;  %s51_s10 = int_to_ptr.vmem [resolvable:$true] %s50_s10 }
  0x26   :  { %p2168_p3 = scmp.lt.u32.totalorder %s2164_s13, %s2831_s4 }
  0x28   :  { %p2170_p4 = pnand %p2168_p3, %p2165_p2 }
  0x2a   :  { %2173 = shalt.err (!%p2170_p4)
}
  0x2b   :  { %s2174_s20 = scalar_lea.vmem %s51_s10, 3072  ;;  %p2179_p6 = scmp.lt.s32.totalorder %s51_s10, %s51_s10 }
  0x2c   :  { %p2175_p5 = scmp.ne.s32.totalorder %s51_s10, %s2174_s20  ;;  %p2180_p7 = scmp.lt.s32.totalorder %s2174_s20, %s2174_s20 }
  0x2e   :  { %p2181_p8 = por %p2180_p7, %p2179_p6 }
  0x30   :  { %p2182_p9 = pnand %p2181_p8, %p2175_p5 }
  0x32   :  { %2185 = shalt.err (!%p2182_p9)
}
  0x33   :  { %s2243_s0 = smov 192   ;;  %s2244_s30 = smov 12  }
  0x34   :  { %56 = dma.hbm_to_vmem [thread:$0]  %s2831_s4, 3072, %s51_s10, [#allocation6], %s2243_s0, %s2243_s0, %s2244_s30  }
  0x35   :  { %s2245_s23 = smov [#allocation8]   ;;  %s2186_s27 = scalar_lea.hbm %s2833_s6, 1024 }
  0x36   :  { %s64_s24 = sshll.u32 %s2245_s23, 4  ;;  %p2187_p10 = scmp.ne.s32.totalorder %s2833_s6, %s2186_s27  ;;  %s65_s24 = int_to_ptr.vmem [resolvable:$true] %s64_s24 }
  0x37   :  { %p2190_p11 = scmp.lt.u32.totalorder %s2186_s27, %s2833_s6 }
  0x39   :  { %p2192_p12 = pnand %p2190_p11, %p2187_p10 }
  0x3b   :  { %2195 = shalt.err (!%p2192_p12)
}
  0x3c   :  { %s2196_s11 = scalar_lea.vmem %s65_s24, 1024  ;;  %p2201_p0 = scmp.lt.s32.totalorder %s65_s24, %s65_s24 }
  0x3d   :  { %p2197_p13 = scmp.ne.s32.totalorder %s65_s24, %s2196_s11  ;;  %p2202_p1 = scmp.lt.s32.totalorder %s2196_s11, %s2196_s11 }
  0x3f   :  { %p2203_p2 = por %p2202_p1, %p2201_p0 }
  0x41   :  { %p2204_p3 = pnand %p2203_p2, %p2197_p13 }
  0x43   :  { %2207 = shalt.err (!%p2204_p3)
}
  0x44   :  { %s2246_s4 = smov 64   ;;  %s2247_s10 = smov 4  }
  0x45   :  { %70 = dma.hbm_to_vmem [thread:$0]  %s2833_s6, 1024, %s65_s24, [#allocation9], %s2246_s4, %s2246_s4, %s2247_s10  }
  0x46   :  { %2230 = dma.done.wait [#allocation3], 2048  }
  0x47   :  { %2231 = vsyncadd [#allocation3], 4294965248 }
  0x48   :  { %2232 = dma.done.wait [#allocation6], 5120  }
  0x49   :  { %2233 = vsyncadd [#allocation6], 4294962176 }
  0x4a   :  { %2234 = dma.done.wait [#allocation9], 1024  }
  0x4b   :  { %2235 = vsyncadd [#allocation9], 4294966272  ;;  %v2248_v0 = vmov 0.0|0.0   ;;  %vm2249_vm0 = vmmov 0   ;;  %v2250_v1 = vmov 0.0   ;;  %v128_v2 = vld [vmem:[#allocation5] sm:$0xff] }
  0x4c   :  { %1934 = vmatprep.subr.bf16.mxu1 %v2248_v0  ;;  %1768 = vmatprep.mubr.msk.f32.mxu1 %vm2249_vm0, %v2250_v1  ;;  %v129_v3 = vld [vmem:[#allocation5 + $0x8] sm:$0xff]  ;;  %v130_v4 = vld [vmem:[#allocation5 + $0x10] sm:$0xff]  ;;  %v131_v6 = vld [vmem:[#allocation5 + $0x18] sm:$0xff]  ;;  %vm146_vm1 = vcmask 1041409   ;;  %vm1029_vm2 = vcmask 523264  }
  0x4d   :  { %v2363_v5 = vpack.c.bf16 %v129_v3, %v128_v2  ;;  %v2366_v7 = vpack.c.bf16 %v131_v6, %v130_v4  ;;  %v132_v8 = vld [vmem:[#allocation5 + $0x20] sm:$0xff]  ;;  %v133_v9 = vld [vmem:[#allocation5 + $0x28] sm:$0xff]  ;;  %v2373_v12 = vld [vmem:[#allocation2 + $0x10] sm:$0xff] }
  0x4e   :  { %v2369_v10 = vld [vmem:[#allocation2] sm:$0xff]  ;;  %v2371_v11 = vld [vmem:[#allocation2 + $0x8] sm:$0xff]  ;;  %v2378_v14 = vpack.c.bf16 %v133_v9, %v132_v8  ;;  %v134_v15 = vld [vmem:[#allocation5 + $0x30] sm:$0xff]  ;;  %v2251_v9 = vmov 1966171168  }
  0x4f   :  { %1936 = vmatpush3.bf16.msra.mxu1 %v2363_v5  ;;  %v102_v13 = vadd.f32 %v2371_v11, %v2369_v10  ;;  %v135_v16 = vld [vmem:[#allocation5 + $0x38] sm:$0xff]  ;;  %v2383_v18 = vld [vmem:[#allocation2 + $0x40] sm:$0xff]  ;;  %v2385_v19 = vld [vmem:[#allocation2 + $0x48] sm:$0xff] }
  0x50   :  { %1937 = vmatprep.subr.bf16.mxu1 %v2248_v0  ;;  %v2380_v17 = vld [vmem:[#allocation2 + $0x18] sm:$0xff]  ;;  %v2387_v20 = vld [vmem:[#allocation2 + $0x50] sm:$0xff]  ;;  %v2390_v22 = vld [vmem:[#allocation2 + $0x20] sm:$0xff]  ;;  %v115_v24 = vadd.f32 %v2385_v19, %v2383_v18  ;;  %v1944_v30 = vpack.c.bf16 %v135_v16, %v134_v15 }
  0x51   :  { %v103_v21 = vadd.f32 %v102_v13, %v2373_v12  ;;  %v2392_v23 = vld [vmem:[#allocation2 + $0x28] sm:$0xff]  ;;  %v136_v25 = vld [vmem:[#allocation5 + $0x40] sm:$0xff]  ;;  %v2396_v27 = vld [vmem:[#allocation2 + $0x58] sm:$0xff]  ;;  %v221_v13 = vunpack.c.l.s4 %v2251_v9 }
  0x52   :  { %v137_v26 = vld [vmem:[#allocation5 + $0x48] sm:$0xff]  ;;  %v2398_v28 = vld [vmem:[#allocation2 + $0x60] sm:$0xff]  ;;  %v2402_v31 = vld [vmem:[#allocation2 + $0x30] sm:$0xff]  ;;  %v116_v32 = vadd.f32 %v115_v24, %v2387_v20 }
  0x53   :  { %1939 = vmatpush3.bf16.msra.mxu1 %v2366_v7  ;;  %v104_v29 = vadd.f32 %v103_v21, %v2380_v17  ;;  %v2406_v33 = vld [vmem:[#allocation2 + $0x68] sm:$0xff]  ;;  %v2409_v35 = vld [vmem:[#allocation2 + $0x38] sm:$0xff]  ;;  %v138_v37 = vld [vmem:[#allocation5 + $0x50] sm:$0xff]  ;;  %v1947_v41 = vpack.c.bf16 %v137_v26, %v136_v25  ;;  %v222_v15 = vunpack.c.0.s8 %v221_v13 }
  0x54   :  { %1940 = vmatprep.subr.bf16.mxu1 %v2248_v0  ;;  %v117_v36 = vadd.f32 %v116_v32, %v2396_v27  ;;  %v139_v38 = vld [vmem:[#allocation5 + $0x58] sm:$0xff]  ;;  %v2412_v39 = vld [vmem:[#allocation2 + $0x70] sm:$0xff]  ;;  %v140_v46 = vld [vmem:[#allocation5 + $0x60] sm:$0xff] }
  0x55   :  { %v105_v34 = vadd.f32 %v104_v29, %v2390_v22  ;;  %v2417_v43 = vld [vmem:[#allocation2 + $0x78] sm:$0xff]  ;;  %v141_v47 = vld [vmem:[#allocation5 + $0x68] sm:$0xff]  ;;  %v1950_v49 = vpack.c.bf16 %v139_v38, %v138_v37  ;;  %v142_v55 = vld [vmem:[#allocation5 + $0x70] sm:$0xff] }
  0x56   :  { %v118_v42 = vadd.f32 %v117_v36, %v2398_v28  ;;  %v1953_v54 = vpack.c.bf16 %v141_v47, %v140_v46  ;;  %v143_v57 = vld [vmem:[#allocation5 + $0x78] sm:$0xff] }
  0x57   :  { %1942 = vmatpush3.bf16.msra.mxu1 %v2378_v14  ;;  %v106_v40 = vadd.f32 %v105_v34, %v2392_v23  ;;  %v1956_v61 = vpack.c.bf16 %v143_v57, %v142_v55 }
  0x58   :  { %1943 = vmatprep.subr.bf16.mxu1 %v2248_v0  ;;  %v119_v45 = vadd.f32 %v118_v42, %v2406_v33 }
  0x59   :  { %v107_v44 = vadd.f32 %v106_v40, %v2402_v31 }
  0x5a   :  { %v120_v50 = vadd.f32 %v119_v45, %v2412_v39 }
  0x5b   :  { %1945 = vmatpush3.bf16.msra.mxu1 %v1944_v30  ;;  %v108_v48 = vadd.f32 %v107_v44, %v2409_v35 }
  0x5c   :  { %1946 = vmatprep.subr.bf16.mxu1 %v2248_v0  ;;  %v121_v52 = vadd.f32 %v120_v50, %v2417_v43 }
  0x5d   :  { %v109_v51 = vrot.slane %v108_v48, 4 }
  0x5e   :  { %v122_v56 = vrot.slane %v121_v52, 4 }
  0x5f   :  { %1948 = vmatpush3.bf16.msra.mxu1 %v1947_v41  ;;  %v110_v53 = vadd.f32 %v109_v51, %v108_v48 }
  0x60   :  { %1949 = vmatprep.subr.bf16.mxu1 %v2248_v0  ;;  %v123_v59 = vadd.f32 %v122_v56, %v121_v52 }
  0x61   :  { %v111_v58 = vrot.slane %v110_v53, 2 }
  0x62   :  { %v124_v62 = vrot.slane %v123_v59, 2 }
  0x63   :  { %1951 = vmatpush3.bf16.msra.mxu1 %v1950_v49  ;;  %v112_v60 = vadd.f32 %v111_v58, %v110_v53 }
  0x64   :  { %1952 = vmatprep.subr.bf16.mxu1 %v2248_v0  ;;  %v125_v2 = vadd.f32 %v124_v62, %v123_v59 }
  0x65   :  { %v113_v63 = vrot.slane %v112_v60, 1 }
  0x66   :  { %v126_v4 = vrot.slane %v125_v2, 1 }
  0x67   :  { %1954 = vmatpush3.bf16.msra.mxu1 %v1953_v54  ;;  %v114_v3 = vadd.f32 %v113_v63, %v112_v60 }
  0x68   :  { %1955 = vmatprep.subr.bf16.mxu1 %v2248_v0  ;;  %v127_v6 = vadd.f32 %v126_v4, %v125_v2 }
  0x6a   :  { %v147_v8 = vsel %vm146_vm1, %v127_v6, %v114_v3 }
  0x6b   :  { %1957 = vmatpush3.bf16.msra.mxu1 %v1956_v61 }
  0x6c   :  { %1958 = vmatprep.subr.bf16.mxu1 %v2248_v0 }
  0x6e   :  { %1769 = vmatmul.mubr.f32.vlgmr.msra.gmra.mrb[0].mxu1 %v147_v8 }
  0x6f   :  { %1960 = vmatpush3.bf16.msra.mxu1 %v2363_v5  ;;  %1803 = vmatprep.mubr.msk.f32.mxu1 %vm2249_vm0, %v2250_v1  ;;  %v1998_v1 = vld [vmem:[#allocation7 + $0x4] ss:$12 sps:$4 sm:$0xff]   ;;  %v2000_v5 = vld [vmem:[#allocation7] ss:$12 sps:$4 sm:$0xff]  }
  0x70   :  { %1961 = vmatprep.subr.bf16.mxu1 %v2248_v0  ;;  %665 = vmatprep.subr.bf16.mxu0 %v1998_v1 }
  0x71   :  { %666 = vmatpush1.bf16.msra.mxu0 %v2000_v5 }
  0x73   :  { %1963 = vmatpush3.bf16.msra.mxu1 %v2366_v7  ;;  %v2441_v7 = vld [vmem:[#allocation7 + $0x8] ss:$12 sps:$4 sm:$0xff]  }
  0x74   :  { %1964 = vmatprep.subr.bf16.mxu1 %v2248_v0 }
  0x77   :  { %1966 = vmatpush3.bf16.msra.mxu1 %v2378_v14  ;;  %v223_v14 = vlaneseq }
  0x78   :  { %1967 = vmatprep.subr.bf16.mxu1 %v2248_v0 }
  0x79   :  { %v2444_v16 = vshrl.u32 %v223_v14, 7 }
  0x7b   :  { %1969 = vmatpush3.bf16.msra.mxu1 %v1944_v30  ;;  %v2447_v21 = vsub.s32 %v222_v15, %v2444_v16  ;;  %v2451_v25 = vsub.s32 0, %v2444_v16 }
  0x7c   :  { %1970 = vmatprep.subr.bf16.mxu1 %v2248_v0 }
  0x7f   :  { %1972 = vmatpush3.bf16.msra.mxu1 %v1947_v41 }
  0x80   :  { %1973 = vmatprep.subr.bf16.mxu1 %v2248_v0 }
  0x83   :  { %1975 = vmatpush3.bf16.msra.mxu1 %v1950_v49 }
  0x84   :  { %1976 = vmatprep.subr.bf16.mxu1 %v2248_v0 }
  0x87   :  { %1978 = vmatpush3.bf16.msra.mxu1 %v1953_v54 }
  0x88   :  { %1979 = vmatprep.subr.bf16.mxu1 %v2248_v0 }
  0x8b   :  { %1981 = vmatpush3.bf16.msra.mxu1 %v1956_v61 }
  0x8c   :  { %1806 = vmatprep.subr.bf16.mxu1 %v2441_v7 }
 0x141   :  { %v215_v24 = vpop.f32.mrb[0].mxu1 }
 0x142   :  { %v226_v0 = vrot.slane %v215_v24, %v2447_v21  ;;  %v1770_v26 = vpop.f32.mrb[1].mxu1 }
 0x144   :  { %v227_v29 = vcombine.high %v226_v0, %v226_v0  ;;  %v234_v30 = vrot.slane %v226_v0, %v2447_v21 }
 0x146   :  { %v241_v32 = vrot.slane %v227_v29, %v2447_v21  ;;  %v245_v34 = vrot.slane %v234_v30, %v2451_v25 }
 0x148   :  { %v249_v36 = vrot.slane %v241_v32, %v2451_v25  ;;  %v2458_v37 = vsub.f32 %v2369_v10, %v245_v34  ;;  %v2461_v38 = vsub.f32 %v2371_v11, %v245_v34  ;;  %v2470_v42 = vsub.f32 %v2373_v12, %v245_v34 }
 0x149   :  { %v2480_v11 = vsub.f32 %v2380_v17, %v245_v34  ;;  %v2500_v49 = vsub.f32 %v2392_v23, %v245_v34  ;;  %v2510_v53 = vsub.f32 %v2402_v31, %v245_v34  ;;  %v2520_v57 = vsub.f32 %v2409_v35, %v245_v34 }
 0x14a   :  { %v2464_v40 = vsub.f32 %v2383_v18, %v249_v36  ;;  %v2467_v41 = vsub.f32 %v2385_v19, %v249_v36  ;;  %v2473_v44 = vsub.f32 %v2387_v20, %v249_v36  ;;  %v268_v45 = vmul.f32 %v2458_v37, %v2458_v37 }
 0x14b   :  { %v269_v10 = vmul.f32 %v2461_v38, %v2461_v38  ;;  %v2483_v18 = vsub.f32 %v2396_v27, %v249_v36  ;;  %v2490_v20 = vsub.f32 %v2390_v22, %v245_v34  ;;  %v2493_v46 = vsub.f32 %v2398_v28, %v249_v36 }
 0x14c   :  { %v276_v19 = vmul.f32 %v2464_v40, %v2464_v40  ;;  %v277_v12 = vmul.f32 %v2467_v41, %v2467_v41  ;;  %v270_v47 = vmul.f32 %v2470_v42, %v2470_v42  ;;  %v278_v17 = vmul.f32 %v2473_v44, %v2473_v44 }
 0x14d   :  { %v284_v27 = vadd.f32 %v269_v10, %v268_v45  ;;  %v2503_v50 = vsub.f32 %v2406_v33, %v249_v36  ;;  %v271_v22 = vmul.f32 %v2480_v11, %v2480_v11  ;;  %v279_v28 = vmul.f32 %v2483_v18, %v2483_v18  ;;  %v2004_v45 = vld [vmem:[#allocation7 + $0x18] ss:$12 sps:$4 sm:$0xff]   ;;  %v2005_v10 = vld [vmem:[#allocation7 + $0x20] ss:$12 sps:$4 sm:$0xff]  }
 0x14e   :  { %v297_v48 = vadd.f32 %v277_v12, %v276_v19  ;;  %v2513_v54 = vsub.f32 %v2412_v39, %v249_v36  ;;  %v272_v23 = vmul.f32 %v2490_v20, %v2490_v20  ;;  %v280_v33 = vmul.f32 %v2493_v46, %v2493_v46  ;;  %v2006_v19 = vld [vmem:[#allocation7 + $0x34] ss:$12 sps:$4 sm:$0xff]   ;;  %v2008_v12 = vld [vmem:[#allocation7 + $0x30] ss:$12 sps:$4 sm:$0xff]  }
 0x14f   :  { %v285_v51 = vadd.f32 %v284_v27, %v270_v47  ;;  %v2523_v58 = vsub.f32 %v2417_v43, %v249_v36  ;;  %v273_v31 = vmul.f32 %v2500_v49, %v2500_v49  ;;  %v281_v39 = vmul.f32 %v2503_v50, %v2503_v50  ;;  %v2002_v36 = vld [vmem:[#allocation7 + $0x1c] ss:$12 sps:$4 sm:$0xff]   ;;  %v2009_v47 = vld [vmem:[#allocation7 + $0x38] ss:$12 sps:$4 sm:$0xff]  }
 0x150   :  { %v298_v52 = vadd.f32 %v297_v48, %v278_v17  ;;  %v274_v61 = vmul.f32 %v2510_v53, %v2510_v53  ;;  %v282_v62 = vmul.f32 %v2513_v54, %v2513_v54  ;;  %v275_v43 = vmul.f32 %v2520_v57, %v2520_v57  ;;  %667 = vmatprep.subr.bf16.mxu0 %v2002_v36  ;;  %v2010_v17 = vld [vmem:[#allocation7 + $0x4c] ss:$12 sps:$4 sm:$0xff]   ;;  %v2012_v27 = vld [vmem:[#allocation7 + $0x48] ss:$12 sps:$4 sm:$0xff]   ;;  %v2013_v48 = vld [vmem:[#allocation7 + $0x50] ss:$12 sps:$4 sm:$0xff]  }
 0x151   :  { %v286_v55 = vadd.f32 %v285_v51, %v271_v22  ;;  %v283_v2 = vmul.f32 %v2523_v58, %v2523_v58  ;;  %668 = vmatpush1.bf16.msra.mxu0 %v2004_v45  ;;  %v2016_v22 = vld [vmem:[#allocation7 + $0x60] ss:$12 sps:$4 sm:$0xff]   ;;  %v2018_v51 = vld [vmem:[#allocation7 + $0x7c] ss:$12 sps:$4 sm:$0xff]  }
 0x152   :  { %v299_v56 = vadd.f32 %v298_v52, %v279_v28  ;;  %669 = vmatprep.subr.bf16.mxu0 %v2006_v19  ;;  %v2017_v28 = vld [vmem:[#allocation7 + $0x68] ss:$12 sps:$4 sm:$0xff]   ;;  %v2020_v52 = vld [vmem:[#allocation7 + $0x78] ss:$12 sps:$4 sm:$0xff]  }
 0x153   :  { %v287_v59 = vadd.f32 %v286_v55, %v272_v23  ;;  %v2021_v23 = vld [vmem:[#allocation7 + $0x80] ss:$12 sps:$4 sm:$0xff]   ;;  %v2024_v55 = vld [vmem:[#allocation7 + $0x90] ss:$12 sps:$4 sm:$0xff]  }
 0x154   :  { %v300_v60 = vadd.f32 %v299_v56, %v280_v33  ;;  %v2022_v33 = vld [vmem:[#allocation7 + $0x94] ss:$12 sps:$4 sm:$0xff]   ;;  %v2025_v56 = vld [vmem:[#allocation7 + $0x98] ss:$12 sps:$4 sm:$0xff]  }
 0x155   :  { %v288_v63 = vadd.f32 %v287_v59, %v273_v31  ;;  %670 = vmatpush1.bf16.msra.mxu0 %v2008_v12  ;;  %v2026_v31 = vld [vmem:[#allocation7 + $0xac] ss:$12 sps:$4 sm:$0xff]   ;;  %v2028_v59 = vld [vmem:[#allocation7 + $0xa8] ss:$12 sps:$4 sm:$0xff]  }
 0x156   :  { %v301_v35 = vadd.f32 %v300_v60, %v281_v39  ;;  %671 = vmatprep.subr.bf16.mxu0 %v2010_v17  ;;  %v2029_v39 = vld [vmem:[#allocation7 + $0xb0] ss:$12 sps:$4 sm:$0xff]   ;;  %v2252_v60 = vmov 0  }
 0x157   :  { %v289_v3 = vadd.f32 %v288_v63, %v274_v61  ;;  %697 = vmatprep.mubr.bf16.mxu0 %v2252_v60 }
 0x158   :  { %v302_v4 = vadd.f32 %v301_v35, %v282_v62 }
 0x159   :  { %v290_v6 = vadd.f32 %v289_v3, %v275_v43  ;;  %672 = vmatpush1.bf16.msra.mxu0 %v2012_v27 }
 0x15a   :  { %v303_v8 = vadd.f32 %v302_v4, %v283_v2 }
 0x15b   :  { %v291_v1 = vrot.slane %v290_v6, 4 }
 0x15c   :  { %v304_v5 = vrot.slane %v303_v8, 4 }
 0x15d   :  { %v292_v9 = vadd.f32 %v291_v1, %v290_v6 }
 0x15e   :  { %v305_v13 = vadd.f32 %v304_v5, %v303_v8  ;;  %v2547_v8 = vld [vmem:[%s2828_s1] ss:$0 sm:$0xff] }
 0x15f   :  { %v293_v14 = vrot.slane %v292_v9, 2 }
 0x160   :  { %v306_v15 = vrot.slane %v305_v13, 2 }
 0x161   :  { %v294_v24 = vadd.f32 %v293_v14, %v292_v9  ;;  %v2556_v14 = vld [vmem:[%s2829_s2] ss:$0 sm:$0xff] }
 0x162   :  { %v307_v0 = vadd.f32 %v306_v15, %v305_v13 }
 0x163   :  { %v295_v26 = vrot.slane %v294_v24, 1 }
 0x164   :  { %v308_v29 = vrot.slane %v307_v0, 1 }
 0x165   :  { %v296_v30 = vadd.f32 %v295_v26, %v294_v24 }
 0x166   :  { %v309_v32 = vadd.f32 %v308_v29, %v307_v0 }
 0x168   :  { %v312_v34 = vsel %vm146_vm1, %v309_v32, %v296_v30 }
 0x169   :  { %1804 = vmatmul.mubr.f32.vlgmr.msra.gmra.mrb[2].mxu1 %v312_v34 }
 0x16a   :  { %1807 = vmatpush3.bf16.msra.mxu1 %v2441_v7  ;;  %v2014_v7 = vld [vmem:[#allocation7 + $0x64] ss:$12 sps:$4 sm:$0xff]  }
 0x16b   :  { %1808 = vmatprep.subr.bf16.mxu1 %v2005_v10  ;;  %673 = vmatprep.subr.bf16.mxu0 %v2014_v7 }
 0x16c   :  { %674 = vmatpush1.bf16.msra.mxu0 %v2016_v22 }
 0x16d   :  { %675 = vmatprep.subr.bf16.mxu0 %v2018_v51 }
 0x16e   :  { %1809 = vmatpush3.bf16.msra.mxu1 %v2005_v10 }
 0x16f   :  { %1810 = vmatprep.subr.bf16.mxu1 %v2009_v47 }
 0x170   :  { %676 = vmatpush1.bf16.msra.mxu0 %v2020_v52 }
 0x171   :  { %677 = vmatprep.subr.bf16.mxu0 %v2022_v33 }
 0x172   :  { %1811 = vmatpush3.bf16.msra.mxu1 %v2009_v47 }
 0x173   :  { %1812 = vmatprep.subr.bf16.mxu1 %v2013_v48 }
 0x174   :  { %678 = vmatpush1.bf16.msra.mxu0 %v2024_v55 }
 0x175   :  { %679 = vmatprep.subr.bf16.mxu0 %v2026_v31 }
 0x176   :  { %1813 = vmatpush3.bf16.msra.mxu1 %v2013_v48 }
 0x177   :  { %1814 = vmatprep.subr.bf16.mxu1 %v2017_v28 }
 0x178   :  { %680 = vmatpush1.bf16.msra.mxu0 %v2028_v59 }
 0x17a   :  { %1815 = vmatpush3.bf16.msra.mxu1 %v2017_v28 }
 0x17b   :  { %1816 = vmatprep.subr.bf16.mxu1 %v2021_v23 }
 0x17e   :  { %1817 = vmatpush3.bf16.msra.mxu1 %v2021_v23 }
 0x17f   :  { %1818 = vmatprep.subr.bf16.mxu1 %v2025_v56 }
 0x182   :  { %1819 = vmatpush3.bf16.msra.mxu1 %v2025_v56 }
 0x183   :  { %1820 = vmatprep.subr.bf16.mxu1 %v2029_v39 }
 0x186   :  { %1821 = vmatpush3.bf16.msra.mxu1 %v2029_v39 }
 0x23c   :  { %v380_v61 = vpop.f32.mrb[2].mxu1 }
 0x23d   :  { %v381_v62 = vadd.f32 1e-05, %v380_v61  ;;  %v1805_v63 = vpop.f32.mrb[3].mxu1 }
 0x23f   :  { %2038 = vrsqrt.f32 %v381_v62 }
 0x249   :  { %v2039_v35 = vpop.eup %2038 }
 0x24a   :  { %v392_v43 = vrot.slane %v2039_v35, %v2447_v21 }
 0x24c   :  { %v393_v2 = vcombine.high %v392_v43, %v392_v43  ;;  %v400_v3 = vrot.slane %v392_v43, %v2447_v21 }
 0x24e   :  { %v407_v4 = vrot.slane %v393_v2, %v2447_v21  ;;  %v411_v6 = vrot.slane %v400_v3, %v2451_v25 }
 0x250   :  { %v418_v1 = vmul.f32 %v411_v6, %v2458_v37  ;;  %v419_v5 = vmul.f32 %v411_v6, %v2461_v38  ;;  %v420_v9 = vmul.f32 %v411_v6, %v2470_v42  ;;  %v415_v13 = vrot.slane %v407_v4, %v2451_v25 }
 0x251   :  { %v421_v21 = vmul.f32 %v411_v6, %v2480_v11  ;;  %v422_v15 = vmul.f32 %v411_v6, %v2490_v20  ;;  %v423_v24 = vmul.f32 %v411_v6, %v2500_v49  ;;  %v424_v42 = vmul.f32 %v411_v6, %v2510_v53 }
 0x252   :  { %v441_v0 = vmul.f32 %v2547_v8, %v418_v1  ;;  %v442_v37 = vmul.f32 %v2547_v8, %v419_v5  ;;  %v443_v38 = vmul.f32 %v2547_v8, %v420_v9  ;;  %v425_v11 = vmul.f32 %v411_v6, %v2520_v57 }
 0x253   :  { %v444_v26 = vmul.f32 %v2547_v8, %v421_v21  ;;  %v445_v29 = vmul.f32 %v2547_v8, %v422_v15  ;;  %v446_v30 = vmul.f32 %v2547_v8, %v423_v24  ;;  %v426_v10 = vmul.f32 %v415_v13, %v2464_v40 }
 0x254   :  { %v464_v20 = vadd.f32 %v2556_v14, %v441_v0  ;;  %v465_v49 = vadd.f32 %v2556_v14, %v442_v37  ;;  %v466_v32 = vadd.f32 %v2556_v14, %v443_v38  ;;  %v427_v19 = vmul.f32 %v415_v13, %v2467_v41 }
 0x255   :  { %v467_v34 = vadd.f32 %v2556_v14, %v444_v26  ;;  %v468_v36 = vadd.f32 %v2556_v14, %v445_v29  ;;  %v469_v53 = vadd.f32 %v2556_v14, %v446_v30  ;;  %v447_v57 = vmul.f32 %v2547_v8, %v424_v42 }
 0x256   :  { %v480_v45 = vpack.c.bf16 %v465_v49, %v464_v20  ;;  %v448_v47 = vmul.f32 %v2547_v8, %v425_v11  ;;  %v449_v27 = vmul.f32 %v2547_v8, %v426_v10  ;;  %v450_v48 = vmul.f32 %v2547_v8, %v427_v19 }
 0x257   :  { %v481_v12 = vpack.c.bf16 %v467_v34, %v466_v32  ;;  %v482_v17 = vpack.c.bf16 %v469_v53, %v468_v36  ;;  %v470_v40 = vadd.f32 %v2556_v14, %v447_v57  ;;  %v428_v7 = vmul.f32 %v415_v13, %v2473_v44 }
 0x258   :  { %698 = vmatmul.mubr.bf16.vlgmr.msra.gmra.mrb[0].mxu0 %v480_v45  ;;  %1822 = vmatprep.mubr.bf16.mxu1 %v480_v45  ;;  %v471_v41 = vadd.f32 %v2556_v14, %v448_v47  ;;  %v429_v22 = vmul.f32 %v415_v13, %v2483_v18  ;;  %v472_v28 = vadd.f32 %v2556_v14, %v449_v27  ;;  %v528_v4 = vsub.s32 1, %v2444_v16 }
 0x259   :  { %1823 = vmatmul.mubr.bf16.vlgmr.msra.gmra.mrb[4].mxu1 %v481_v12  ;;  %707 = vmatprep.mubr.bf16.mxu0 %v2252_v60  ;;  %v473_v51 = vadd.f32 %v2556_v14, %v450_v48  ;;  %v430_v52 = vmul.f32 %v415_v13, %v2493_v46  ;;  %v431_v23 = vmul.f32 %v415_v13, %v2503_v50  ;;  %v532_v6 = vsub.s32 2, %v2444_v16 }
 0x25a   :  { %1826 = vmatprep.mubr.bf16.mxu1 %v482_v17  ;;  %v483_v33 = vpack.c.bf16 %v471_v41, %v470_v40  ;;  %v451_v55 = vmul.f32 %v2547_v8, %v428_v7  ;;  %v452_v56 = vmul.f32 %v2547_v8, %v429_v22  ;;  %v432_v50 = vmul.f32 %v415_v13, %v2513_v54 }
 0x25b   :  { %v484_v31 = vpack.c.bf16 %v473_v51, %v472_v28  ;;  %v453_v39 = vmul.f32 %v2547_v8, %v430_v52  ;;  %v454_v44 = vmul.f32 %v2547_v8, %v431_v23  ;;  %v433_v59 = vmul.f32 %v415_v13, %v2523_v58 }
 0x25c   :  { %v474_v18 = vadd.f32 %v2556_v14, %v451_v55  ;;  %v475_v46 = vadd.f32 %v2556_v14, %v452_v56  ;;  %v455_v35 = vmul.f32 %v2547_v8, %v432_v50 }
 0x25d   :  { %v476_v61 = vadd.f32 %v2556_v14, %v453_v39  ;;  %v477_v62 = vadd.f32 %v2556_v14, %v454_v44  ;;  %v456_v43 = vmul.f32 %v2547_v8, %v433_v59  ;;  %v520_v8 = vld [vmem:[%s2832_s5] sm:$0x7] }
 0x25e   :  { %v485_v63 = vpack.c.bf16 %v475_v46, %v474_v18  ;;  %v478_v3 = vadd.f32 %v2556_v14, %v455_v35  ;;  %v2615_v1 = vrot.slane %v520_v8, %v528_v4  ;;  %v2617_v5 = vrot.slane %v520_v8, %v532_v6 }
 0x25f   :  { %v486_v2 = vpack.c.bf16 %v477_v62, %v476_v61  ;;  %v479_v54 = vadd.f32 %v2556_v14, %v456_v43  ;;  %v2620_v9 = vrot.slane %v520_v8, %v2451_v25 }
 0x260   :  { %708 = vmatmul.mubr.bf16.gmra.mrb[4].mxu0 %v481_v12 }
 0x261   :  { %1827 = vmatmul.mubr.bf16.gmra.mrb[8].mxu1 %v483_v33  ;;  %717 = vmatprep.mubr.bf16.mxu0 %v2252_v60  ;;  %v487_v58 = vpack.c.bf16 %v479_v54, %v478_v3 }
 0x262   :  { %1830 = vmatprep.mubr.bf16.mxu1 %v484_v31 }
 0x268   :  { %718 = vmatmul.mubr.bf16.gmra.mrb[8].mxu0 %v482_v17 }
 0x269   :  { %1831 = vmatmul.mubr.bf16.gmra.mrb[12].mxu1 %v485_v63  ;;  %727 = vmatprep.mubr.bf16.mxu0 %v2252_v60 }
 0x26a   :  { %1834 = vmatprep.mubr.bf16.mxu1 %v486_v2 }
 0x270   :  { %728 = vmatmul.mubr.bf16.gmra.mrb[12].mxu0 %v483_v33 }
 0x271   :  { %1835 = vmatmul.mubr.bf16.gmra.mrb[16].mxu1 %v487_v58  ;;  %737 = vmatprep.mubr.bf16.mxu0 %v2252_v60 }
 0x278   :  { %738 = vmatmul.mubr.bf16.gmra.mrb[16].mxu0 %v484_v31 }
 0x279   :  { %747 = vmatprep.mubr.bf16.mxu0 %v2252_v60 }
 0x280   :  { %748 = vmatmul.mubr.bf16.gmra.mrb[20].mxu0 %v485_v63 }
 0x281   :  { %757 = vmatprep.mubr.bf16.mxu0 %v2252_v60 }
 0x288   :  { %758 = vmatmul.mubr.bf16.gmra.mrb[24].mxu0 %v486_v2 }
 0x289   :  { %767 = vmatprep.mubr.bf16.mxu0 %v2252_v60 }
 0x290   :  { %768 = vmatmul.mubr.bf16.gmra.mrb[28].mxu0 %v487_v58 }
 0x32b   :  { %v699_v13 = vpop.f32.mrb[0].mxu0 }
 0x32c   :  { %v701_v14 = vpop.f32.mrb[1].mxu0  ;;  %v1824_v21 = vpop.f32.mrb[4].mxu1  ;;  %v700_v0 = vadd.f32 %v699_v13, %v2620_v9 }
 0x32d   :  { %v702_v60 = vadd.f32 %v701_v14, %v2615_v1  ;;  %v821_v15 = vadd.f32 %v1824_v21, %v2617_v5  ;;  %v703_v24 = vpop.f32.mrb[2].mxu0  ;;  %v812_v16 = vpop.f32.mrb[5].mxu1 }
 0x32e   :  { %v704_v37 = vadd.f32 %v703_v24, %v2620_v9  ;;  %v813_v38 = vadd.f32 %v812_v16, %v2617_v5  ;;  %v705_v42 = vpop.f32.mrb[3].mxu0  ;;  %v1825_v26 = vpop.f32.mrb[6].mxu1 }
 0x32f   :  { %v706_v25 = vadd.f32 %v705_v42, %v2615_v1  ;;  %v824_v29 = vadd.f32 %v1825_v26, %v2617_v5  ;;  %v815_v30 = vpop.f32.mrb[7].mxu1 }
 0x330   :  { %v875_v11 = vpack.c.bf16 %v704_v37, %v700_v0  ;;  %v816_v20 = vadd.f32 %v815_v30, %v2617_v5 }
 0x331   :  { %v883_v49 = vpack.c.bf16 %v706_v25, %v702_v60  ;;  %v2630_v32 = vpack.c.bf16 %v824_v29, %v821_v15 }
 0x332   :  { %v2632_v34 = vpack.c.bf16 %v816_v20, %v813_v38  ;;  %1846 = vmatprep.mubr.bf16.mxu1 %v875_v11 }
 0x333   :  { %v709_v36 = vpop.f32.mrb[4].mxu0  ;;  %1838 = vmatprep.subr.bf16.mxu1 %v883_v49 }
 0x334   :  { %v711_v53 = vpop.f32.mrb[5].mxu0  ;;  %v1828_v45 = vpop.f32.mrb[8].mxu1  ;;  %1839 = vmatpush3.bf16.xpose.msra.mxu1 %v883_v49  ;;  %v2637_v47 = vadd.f32 %v709_v36, %v2620_v9 }
 0x335   :  { %v712_v10 = vadd.f32 %v711_v53, %v2615_v1  ;;  %v837_v19 = vadd.f32 %v1828_v45, %v2617_v5  ;;  %v713_v12 = vpop.f32.mrb[6].mxu0  ;;  %v828_v57 = vpop.f32.mrb[9].mxu1 }
 0x336   :  { %v2640_v17 = vadd.f32 %v713_v12, %v2620_v9  ;;  %v829_v27 = vadd.f32 %v828_v57, %v2617_v5  ;;  %v715_v48 = vpop.f32.mrb[7].mxu0  ;;  %v1829_v40 = vpop.f32.mrb[10].mxu1 }
 0x337   :  { %v716_v41 = vadd.f32 %v715_v48, %v2615_v1  ;;  %v840_v7 = vadd.f32 %v1829_v40, %v2617_v5  ;;  %v831_v22 = vpop.f32.mrb[11].mxu1 }
 0x338   :  { %v876_v28 = vpack.c.bf16 %v2640_v17, %v2637_v47  ;;  %v832_v51 = vadd.f32 %v831_v22, %v2617_v5 }
 0x339   :  { %v884_v52 = vpack.c.bf16 %v716_v41, %v712_v10  ;;  %v2648_v23 = vpack.c.bf16 %v840_v7, %v837_v19 }
 0x33a   :  { %v2650_v33 = vpack.c.bf16 %v832_v51, %v829_v27 }
 0x33b   :  { %v719_v55 = vpop.f32.mrb[8].mxu0  ;;  %1840 = vmatprep.subr.bf16.mxu1 %v884_v52 }
 0x33c   :  { %v721_v56 = vpop.f32.mrb[9].mxu0  ;;  %v1832_v31 = vpop.f32.mrb[12].mxu1  ;;  %1841 = vmatpush3.bf16.xpose.msra.mxu1 %v884_v52  ;;  %v720_v50 = vadd.f32 %v719_v55, %v2620_v9 }
 0x33d   :  { %v722_v39 = vadd.f32 %v721_v56, %v2615_v1  ;;  %v853_v44 = vadd.f32 %v1832_v31, %v2617_v5  ;;  %v723_v18 = vpop.f32.mrb[10].mxu0  ;;  %v844_v46 = vpop.f32.mrb[13].mxu1 }
 0x33e   :  { %v724_v59 = vadd.f32 %v723_v18, %v2620_v9  ;;  %v845_v61 = vadd.f32 %v844_v46, %v2617_v5  ;;  %v725_v62 = vpop.f32.mrb[11].mxu0  ;;  %v1833_v63 = vpop.f32.mrb[14].mxu1 }
 0x33f   :  { %v726_v35 = vadd.f32 %v725_v62, %v2615_v1  ;;  %v856_v43 = vadd.f32 %v1833_v63, %v2617_v5  ;;  %v847_v2 = vpop.f32.mrb[15].mxu1 }
 0x340   :  { %v877_v3 = vpack.c.bf16 %v724_v59, %v720_v50  ;;  %v848_v54 = vadd.f32 %v847_v2, %v2617_v5 }
 0x341   :  { %v885_v58 = vpack.c.bf16 %v726_v35, %v722_v39  ;;  %v2660_v4 = vpack.c.bf16 %v856_v43, %v853_v44 }
 0x342   :  { %v2662_v6 = vpack.c.bf16 %v848_v54, %v845_v61 }
 0x343   :  { %v729_v8 = vpop.f32.mrb[12].mxu0  ;;  %1842 = vmatprep.subr.bf16.mxu1 %v885_v58 }
 0x344   :  { %v731_v13 = vpop.f32.mrb[13].mxu0  ;;  %v1836_v14 = vpop.f32.mrb[16].mxu1  ;;  %1843 = vmatpush3.bf16.xpose.msra.mxu1 %v885_v58  ;;  %v730_v16 = vadd.f32 %v729_v8, %v2620_v9 }
 0x345   :  { %v732_v21 = vadd.f32 %v731_v13, %v2615_v1  ;;  %v869_v60 = vadd.f32 %v1836_v14, %v2617_v5  ;;  %v733_v15 = vpop.f32.mrb[14].mxu0  ;;  %v860_v24 = vpop.f32.mrb[17].mxu1 }
 0x346   :  { %v734_v0 = vadd.f32 %v733_v15, %v2620_v9  ;;  %v861_v37 = vadd.f32 %v860_v24, %v2617_v5  ;;  %v735_v38 = vpop.f32.mrb[15].mxu0  ;;  %v1837_v42 = vpop.f32.mrb[18].mxu1 }
 0x347   :  { %v736_v26 = vadd.f32 %v735_v38, %v2615_v1  ;;  %v872_v25 = vadd.f32 %v1837_v42, %v2617_v5  ;;  %v863_v29 = vpop.f32.mrb[19].mxu1 }
 0x348   :  { %v878_v30 = vpack.c.bf16 %v734_v0, %v730_v16  ;;  %v864_v11 = vadd.f32 %v863_v29, %v2617_v5 }
 0x349   :  { %v886_v20 = vpack.c.bf16 %v736_v26, %v732_v21  ;;  %v2672_v49 = vpack.c.bf16 %v872_v25, %v869_v60 }
 0x34a   :  { %v2674_v36 = vpack.c.bf16 %v864_v11, %v861_v37 }
 0x34b   :  { %v739_v53 = vpop.f32.mrb[16].mxu0  ;;  %1844 = vmatprep.subr.bf16.mxu1 %v886_v20 }
 0x34c   :  { %v741_v45 = vpop.f32.mrb[17].mxu0  ;;  %1845 = vmatpush3.bf16.xpose.msra.mxu1 %v886_v20  ;;  %v740_v12 = vadd.f32 %v739_v53, %v2620_v9 }
 0x34d   :  { %v742_v10 = vadd.f32 %v741_v45, %v2615_v1  ;;  %v743_v19 = vpop.f32.mrb[18].mxu0  ;;  %1870 = vmatprep.subr.bf16.mxu1 %v2632_v34 }
 0x34e   :  { %v744_v57 = vadd.f32 %v743_v19, %v2620_v9  ;;  %v745_v27 = vpop.f32.mrb[19].mxu0 }
 0x34f   :  { %v746_v5 = vadd.f32 %v745_v27, %v2615_v1 }
 0x350   :  { %v879_v48 = vpack.c.bf16 %v744_v57, %v740_v12 }
 0x351   :  { %v887_v40 = vpack.c.bf16 %v746_v5, %v742_v10 }
 0x352   :  { %1862 = vmatprep.mubr.bf16.mxu0 %v879_v48 }
 0x353   :  { %v749_v41 = vpop.f32.mrb[20].mxu0  ;;  %1847 = vmatmul.mubr.bf16.vlgmr.msra.gmra.mrb[20].mxu1 %v876_v28  ;;  %1854 = vmatprep.subr.bf16.mxu0 %v887_v40 }
 0x354   :  { %v750_v7 = vadd.f32 %v749_v41, %v2620_v9  ;;  %v751_v22 = vpop.f32.mrb[21].mxu0  ;;  %1850 = vmatprep.mubr.bf16.mxu1 %v877_v3  ;;  %1855 = vmatpush3.bf16.xpose.msra.mxu0 %v887_v40 }
 0x355   :  { %v752_v51 = vadd.f32 %v751_v22, %v2615_v1  ;;  %1871 = vmatpush3.bf16.msra.mxu1 %v2632_v34  ;;  %v753_v52 = vpop.f32.mrb[22].mxu0 }
 0x356   :  { %v754_v55 = vadd.f32 %v753_v52, %v2620_v9  ;;  %1872 = vmatprep.subr.bf16.mxu1 %v2630_v32  ;;  %v755_v56 = vpop.f32.mrb[23].mxu0 }
 0x357   :  { %v756_v31 = vadd.f32 %v755_v56, %v2615_v1 }
 0x358   :  { %v880_v47 = vpack.c.bf16 %v754_v55, %v750_v7 }
 0x359   :  { %v888_v17 = vpack.c.bf16 %v756_v31, %v752_v51  ;;  %1873 = vmatpush3.bf16.msra.mxu1 %v2630_v32 }
 0x35a   :  { %1874 = vmatprep.subr.bf16.mxu1 %v2650_v33 }
 0x35b   :  { %v759_v28 = vpop.f32.mrb[24].mxu0  ;;  %1851 = vmatmul.mubr.bf16.gmra.mrb[24].mxu1 %v878_v30  ;;  %1856 = vmatprep.subr.bf16.mxu0 %v888_v17 }
 0x35c   :  { %v760_v39 = vadd.f32 %v759_v28, %v2620_v9  ;;  %v761_v34 = vpop.f32.mrb[25].mxu0  ;;  %1857 = vmatpush3.bf16.xpose.msra.mxu0 %v888_v17 }
 0x35d   :  { %v762_v44 = vadd.f32 %v761_v34, %v2615_v1  ;;  %1875 = vmatpush3.bf16.msra.mxu1 %v2650_v33  ;;  %v763_v18 = vpop.f32.mrb[26].mxu0 }
 0x35e   :  { %v764_v46 = vadd.f32 %v763_v18, %v2620_v9  ;;  %1876 = vmatprep.subr.bf16.mxu1 %v2648_v23  ;;  %v765_v50 = vpop.f32.mrb[27].mxu0 }
 0x35f   :  { %v766_v32 = vadd.f32 %v765_v50, %v2615_v1 }
 0x360   :  { %v881_v59 = vpack.c.bf16 %v764_v46, %v760_v39 }
 0x361   :  { %v889_v61 = vpack.c.bf16 %v766_v32, %v762_v44  ;;  %1877 = vmatpush3.bf16.msra.mxu1 %v2648_v23 }
 0x362   :  { %1886 = vmatprep.subr.bf16.mxu1 %v2662_v6 }
 0x363   :  { %v769_v62 = vpop.f32.mrb[28].mxu0  ;;  %1858 = vmatprep.subr.bf16.mxu0 %v889_v61 }
 0x364   :  { %v770_v63 = vadd.f32 %v769_v62, %v2620_v9  ;;  %v771_v35 = vpop.f32.mrb[29].mxu0  ;;  %1859 = vmatpush3.bf16.xpose.msra.mxu0 %v889_v61 }
 0x365   :  { %v772_v33 = vadd.f32 %v771_v35, %v2615_v1  ;;  %v773_v43 = vpop.f32.mrb[30].mxu0 }
 0x366   :  { %v774_v2 = vadd.f32 %v773_v43, %v2620_v9  ;;  %v775_v3 = vpop.f32.mrb[31].mxu0 }
 0x367   :  { %v776_v54 = vadd.f32 %v775_v3, %v2615_v1 }
 0x368   :  { %v882_v58 = vpack.c.bf16 %v774_v2, %v770_v63 }
 0x369   :  { %v890_v8 = vpack.c.bf16 %v776_v54, %v772_v33 }
 0x36b   :  { %1860 = vmatprep.subr.bf16.mxu0 %v890_v8 }
 0x36c   :  { %1861 = vmatpush3.bf16.xpose.msra.mxu0 %v890_v8 }
 0x373   :  { %1863 = vmatmul.mubr.bf16.vlgmr.msra.gmra.mrb[32].mxu0 %v880_v47 }
 0x374   :  { %1866 = vmatprep.mubr.bf16.mxu0 %v881_v59 }
 0x37b   :  { %1867 = vmatmul.mubr.bf16.gmra.mrb[36].mxu0 %v882_v58 }
 0x426   :  { %v1848_v23 = vpop.f32.mrb[20].mxu1 }
 0x427   :  { %v933_v13 = vpop.f32.mrb[21].mxu1  ;;  %v1036_v14 = vsel %vm1029_vm2, %v1848_v23, -inf }
 0x428   :  { %1037 = vmax.xlane.f32.xlu1 %v1036_v14  ;;  %v1849_v21 = vpop.f32.mrb[22].mxu1  ;;  %v1030_v60 = vsel %vm1029_vm2, %v933_v13, -inf }
 0x429   :  { %1031 = vmax.xlane.f32.xlu0 %v1030_v60  ;;  %v936_v9 = vpop.f32.mrb[23].mxu1  ;;  %v1039_v1 = vsel %vm1029_vm2, %v1849_v21, -inf }
 0x42a   :  { %v1033_v15 = vsel %vm1029_vm2, %v936_v9, -inf }
 0x42c   :  { %1040 = vmax.xlane.f32.xlu1 %v1039_v1 }
 0x42d   :  { %1034 = vmax.xlane.f32.xlu0 %v1033_v15 }
 0x42e   :  { %v2708_v24 = vpop.f32.mrb[24].mxu1 }
 0x42f   :  { %v949_v16 = vpop.f32.mrb[25].mxu1  ;;  %v1048_v26 = vsel %vm1029_vm2, %v2708_v24, -inf }
 0x430   :  { %v2710_v0 = vpop.f32.mrb[26].mxu1  ;;  %v1042_v37 = vsel %vm1029_vm2, %v949_v16, -inf }
 0x431   :  { %1043 = vmax.xlane.f32.xlu0 %v1042_v37  ;;  %v952_v38 = vpop.f32.mrb[27].mxu1  ;;  %v1051_v25 = vsel %vm1029_vm2, %v2710_v0, -inf }
 0x432   :  { %v1045_v42 = vsel %vm1029_vm2, %v952_v38, -inf }
 0x433   :  { %1046 = vmax.xlane.f32.xlu1 %v1045_v42 }
 0x435   :  { %1049 = vmax.xlane.f32.xlu0 %v1048_v26 }
 0x437   :  { %1052 = vmax.xlane.f32.xlu1 %v1051_v25 }
 0x446   :  { %v2718_v29 = vpop.f32.mrb[32].mxu0 }
 0x447   :  { %v2720_v30 = vpop.f32.mrb[33].mxu0  ;;  %v1060_v10 = vsel %vm1029_vm2, %v2718_v29, -inf }
 0x448   :  { %v2722_v11 = vpop.f32.mrb[34].mxu0  ;;  %v1054_v20 = vsel %vm1029_vm2, %v2720_v30, -inf }
 0x449   :  { %v2726_v53 = vpop.f32.mrb[35].mxu0  ;;  %1055 = vmax.xlane.f32.xlu0 %v1054_v20  ;;  %v1063_v12 = vsel %vm1029_vm2, %v2722_v11, -inf }
 0x44a   :  { %v1057_v45 = vsel %vm1029_vm2, %v2726_v53, -inf }
 0x44b   :  { %1058 = vmax.xlane.f32.xlu1 %v1057_v45 }
 0x44d   :  { %1061 = vmax.xlane.f32.xlu0 %v1060_v10 }
 0x44e   :  { %v2732_v19 = vpop.f32.mrb[36].mxu0 }
 0x44f   :  { %v2736_v57 = vpop.f32.mrb[37].mxu0  ;;  %1064 = vmax.xlane.f32.xlu1 %v1063_v12  ;;  %v1072_v41 = vsel %vm1029_vm2, %v2732_v19, -inf }
 0x450   :  { %v2738_v27 = vpop.f32.mrb[38].mxu0  ;;  %v1066_v5 = vsel %vm1029_vm2, %v2736_v57, -inf }
 0x451   :  { %v2742_v48 = vpop.f32.mrb[39].mxu0  ;;  %1067 = vmax.xlane.f32.xlu0 %v1066_v5  ;;  %v1075_v7 = vsel %vm1029_vm2, %v2738_v27, -inf }
 0x452   :  { %v1069_v40 = vsel %vm1029_vm2, %v2742_v48, -inf }
 0x453   :  { %1070 = vmax.xlane.f32.xlu1 %v1069_v40 }
 0x455   :  { %1073 = vmax.xlane.f32.xlu0 %v1072_v41 }
 0x457   :  { %1076 = vmax.xlane.f32.xlu1 %v1075_v7 }
 0x4b5   :  { %v1038_v22 = vpop.xlane.xlu1 %1037 }
 0x4b6   :  { %v1080_v51 = vsub.f32 %v1848_v23, %v1038_v22  ;;  %v1032_v52 = vpop.xlane.xlu0 %1031 }
 0x4b7   :  { %v1078_v55 = vsub.f32 %v933_v13, %v1032_v52 }
 0x4b8   :  { %v1098_v56 = vmul.f32 1.442695, %v1080_v51 }
 0x4b9   :  { %v1094_v31 = vmul.f32 1.442695, %v1078_v55  ;;  %v1041_v47 = vpop.xlane.xlu1 %1040 }
 0x4ba   :  { %v1081_v17 = vsub.f32 %v1849_v21, %v1041_v47  ;;  %v1035_v28 = vpop.xlane.xlu0 %1034 }
 0x4bb   :  { %2040 = vpow2.f32 %v1094_v31  ;;  %v1079_v39 = vsub.f32 %v936_v9, %v1035_v28 }
 0x4bc   :  { %v1100_v34 = vmul.f32 1.442695, %v1081_v17  ;;  %2042 = vpow2.f32 %v1098_v56 }
 0x4bd   :  { %v1096_v44 = vmul.f32 1.442695, %v1079_v39 }
 0x4be   :  { %2044 = vpow2.f32 %v1100_v34  ;;  %v1044_v18 = vpop.xlane.xlu0 %1043 }
 0x4bf   :  { %2046 = vpow2.f32 %v1096_v44  ;;  %v1082_v46 = vsub.f32 %v949_v16, %v1044_v18 }
 0x4c0   :  { %v1047_v50 = vpop.xlane.xlu1 %1046 }
 0x4c1   :  { %v1102_v32 = vmul.f32 1.442695, %v1082_v46  ;;  %v1083_v59 = vsub.f32 %v952_v38, %v1047_v50 }
 0x4c2   :  { %v1050_v61 = vpop.xlane.xlu0 %1049 }
 0x4c3   :  { %2048 = vpow2.f32 %v1102_v32  ;;  %v1104_v62 = vmul.f32 1.442695, %v1083_v59  ;;  %v1084_v63 = vsub.f32 %v2708_v24, %v1050_v61 }
 0x4c4   :  { %v1053_v35 = vpop.xlane.xlu1 %1052 }
 0x4c5   :  { %v2041_v33 = vpop.eup %2040  ;;  %2050 = vpow2.f32 %v1104_v62  ;;  %v1106_v43 = vmul.f32 1.442695, %v1084_v63  ;;  %v1085_v2 = vsub.f32 %v2710_v0, %v1053_v35 }
 0x4c6   :  { %v1126_v3 = vsel %vm1029_vm2, %v2041_v33, 0.0  ;;  %v2043_v54 = vpop.eup %2042 }
 0x4c7   :  { %2052 = vpow2.f32 %v1106_v43  ;;  %v1108_v58 = vmul.f32 1.442695, %v1085_v2  ;;  %1127 = vadd.xlane.f32.xlu0 %v1126_v3  ;;  %v1132_v14 = vsel %vm1029_vm2, %v2043_v54, 0.0  ;;  %v2030_v3 = vld [vmem:[#allocation8] sm:$0xff]  }
 0x4c8   :  { %v2045_v8 = vpop.eup %2044  ;;  %1902 = vmatprep.subr.bf16.mxu0 %v2030_v3 }
 0x4c9   :  { %v2047_v23 = vpop.eup %2046  ;;  %v1175_v13 = vpack.c.bf16 %v2045_v8, %v2043_v54  ;;  %2054 = vpow2.f32 %v1108_v58  ;;  %v1135_v24 = vsel %vm1029_vm2, %v2045_v8, 0.0  ;;  %v2031_v54 = vld [vmem:[#allocation8 + $0x8] sm:$0xff]   ;;  %1903 = vmatpush3.bf16.msra.mxu0 %v2030_v3  ;;  %v2032_v58 = vld [vmem:[#allocation8 + $0x10] sm:$0xff]   ;;  %v2033_v8 = vld [vmem:[#allocation8 + $0x18] sm:$0xff]  }
 0x4ca   :  { %v1129_v21 = vsel %vm1029_vm2, %v2047_v23, 0.0  ;;  %v1174_v60 = vpack.c.bf16 %v2047_v23, %v2041_v33  ;;  %1904 = vmatprep.subr.bf16.mxu0 %v2031_v54  ;;  %v2034_v23 = vld [vmem:[#allocation8 + $0x20] sm:$0xff]  }
 0x4cb   :  { %1133 = vadd.xlane.f32.xlu0 %v1132_v14  ;;  %1130 = vadd.xlane.f32.xlu1 %v1129_v21  ;;  %v2036_v14 = vld [vmem:[#allocation8 + $0x30] sm:$0xff]   ;;  %v2037_v21 = vld [vmem:[#allocation8 + $0x38] sm:$0xff]  }
 0x4cc   :  { %1878 = vmatprep.mubr.msk.bf16.mxu1 %vm1029_vm2, %v1174_v60 }
 0x4cd   :  { %v2049_v9 = vpop.eup %2048  ;;  %1879 = vmatmul.mubr.msk.bf16.vlgmr.msra.gmra.mrb[28].mxu1 %vm1029_vm2, %v1175_v13  ;;  %1905 = vmatpush3.bf16.msra.mxu0 %v2031_v54  ;;  %v2035_v13 = vld [vmem:[#allocation8 + $0x28] sm:$0xff]  }
 0x4ce   :  { %1887 = vmatpush3.bf16.msra.mxu1 %v2662_v6  ;;  %v1138_v1 = vsel %vm1029_vm2, %v2049_v9, 0.0  ;;  %1906 = vmatprep.subr.bf16.mxu0 %v2032_v58 }
 0x4cf   :  { %v2051_v15 = vpop.eup %2050  ;;  %1888 = vmatprep.subr.bf16.mxu1 %v2660_v4  ;;  %1139 = vadd.xlane.f32.xlu0 %v1138_v1 }
 0x4d0   :  { %1136 = vadd.xlane.f32.xlu1 %v1135_v24  ;;  %v1176_v16 = vpack.c.bf16 %v2051_v15, %v2049_v9  ;;  %v1141_v6 = vsel %vm1029_vm2, %v2051_v15, 0.0 }
 0x4d1   :  { %v2053_v0 = vpop.eup %2052  ;;  %1907 = vmatpush3.bf16.msra.mxu0 %v2032_v58 }
 0x4d2   :  { %1889 = vmatpush3.bf16.msra.mxu1 %v2660_v4  ;;  %1882 = vmatprep.mubr.msk.bf16.mxu1 %vm1029_vm2, %v1176_v16  ;;  %v1144_v37 = vsel %vm1029_vm2, %v2053_v0, 0.0 }
 0x4d3   :  { %v2055_v38 = vpop.eup %2054  ;;  %1890 = vmatprep.subr.bf16.mxu1 %v2674_v36  ;;  %1145 = vadd.xlane.f32.xlu0 %v1144_v37 }
 0x4d4   :  { %1142 = vadd.xlane.f32.xlu1 %v1141_v6  ;;  %v1177_v42 = vpack.c.bf16 %v2055_v38, %v2053_v0  ;;  %v1147_v4 = vsel %vm1029_vm2, %v2055_v38, 0.0  ;;  %1908 = vmatprep.subr.bf16.mxu0 %v2033_v8 }
 0x4d5   :  { %1909 = vmatpush3.bf16.msra.mxu0 %v2033_v8 }
 0x4d6   :  { %1891 = vmatpush3.bf16.msra.mxu1 %v2674_v36  ;;  %v1056_v26 = vpop.xlane.xlu0 %1055  ;;  %1910 = vmatprep.subr.bf16.mxu0 %v2034_v23 }
 0x4d7   :  { %v1086_v25 = vsub.f32 %v2720_v30, %v1056_v26  ;;  %1883 = vmatmul.mubr.msk.bf16.gmra.mrb[32].mxu1 %vm1029_vm2, %v1177_v42  ;;  %1892 = vmatprep.subr.bf16.mxu1 %v2672_v49 }
 0x4d8   :  { %1148 = vadd.xlane.f32.xlu1 %v1147_v4  ;;  %v1059_v20 = vpop.xlane.xlu1 %1058 }
 0x4d9   :  { %v1110_v45 = vmul.f32 1.442695, %v1086_v25  ;;  %v1087_v10 = vsub.f32 %v2726_v53, %v1059_v20  ;;  %1911 = vmatpush3.bf16.msra.mxu0 %v2034_v23 }
 0x4da   :  { %1893 = vmatpush3.bf16.msra.mxu1 %v2672_v49  ;;  %v1062_v12 = vpop.xlane.xlu0 %1061  ;;  %1912 = vmatprep.subr.bf16.mxu0 %v2035_v13 }
 0x4db   :  { %2056 = vpow2.f32 %v1110_v45  ;;  %v1112_v5 = vmul.f32 1.442695, %v1087_v10  ;;  %v1088_v36 = vsub.f32 %v2718_v29, %v1062_v12 }
 0x4dc   :  { %v1065_v40 = vpop.xlane.xlu1 %1064 }
 0x4dd   :  { %2058 = vpow2.f32 %v1112_v5  ;;  %v1114_v30 = vmul.f32 1.442695, %v1088_v36  ;;  %v1089_v41 = vsub.f32 %v2722_v11, %v1065_v40  ;;  %1913 = vmatpush3.bf16.msra.mxu0 %v2035_v13 }
 0x4de   :  { %v1068_v7 = vpop.xlane.xlu0 %1067  ;;  %1914 = vmatprep.subr.bf16.mxu0 %v2036_v14 }
 0x4df   :  { %2060 = vpow2.f32 %v1114_v30  ;;  %v1116_v22 = vmul.f32 1.442695, %v1089_v41  ;;  %v1090_v51 = vsub.f32 %v2736_v57, %v1068_v7 }
 0x4e0   :  { %v1071_v52 = vpop.xlane.xlu1 %1070 }
 0x4e1   :  { %2062 = vpow2.f32 %v1116_v22  ;;  %v1118_v53 = vmul.f32 1.442695, %v1090_v51  ;;  %v1091_v49 = vsub.f32 %v2742_v48, %v1071_v52  ;;  %1915 = vmatpush3.bf16.msra.mxu0 %v2036_v14 }
 0x4e2   :  { %v1074_v55 = vpop.xlane.xlu0 %1073  ;;  %1916 = vmatprep.subr.bf16.mxu0 %v2037_v21 }
 0x4e3   :  { %2064 = vpow2.f32 %v1118_v53  ;;  %v1120_v56 = vmul.f32 1.442695, %v1091_v49  ;;  %v1092_v29 = vsub.f32 %v2732_v19, %v1074_v55 }
 0x4e4   :  { %v1077_v31 = vpop.xlane.xlu1 %1076 }
 0x4e5   :  { %v2057_v47 = vpop.eup %2056  ;;  %2066 = vpow2.f32 %v1120_v56  ;;  %v1122_v17 = vmul.f32 1.442695, %v1092_v29  ;;  %v1093_v11 = vsub.f32 %v2738_v27, %v1077_v31  ;;  %1917 = vmatpush3.bf16.msra.mxu0 %v2037_v21 }
 0x4e6   :  { %v1150_v28 = vsel %vm1029_vm2, %v2057_v47, 0.0 }
 0x4e7   :  { %v2059_v39 = vpop.eup %2058  ;;  %2068 = vpow2.f32 %v1122_v17  ;;  %v1124_v57 = vmul.f32 1.442695, %v1093_v11  ;;  %1151 = vadd.xlane.f32.xlu0 %v1150_v28 }
 0x4e8   :  { %v1153_v34 = vsel %vm1029_vm2, %v2059_v39, 0.0  ;;  %v1178_v48 = vpack.c.bf16 %v2059_v39, %v2057_v47 }
 0x4e9   :  { %v2061_v44 = vpop.eup %2060  ;;  %2070 = vpow2.f32 %v1124_v57  ;;  %1154 = vadd.xlane.f32.xlu1 %v1153_v34 }
 0x4ea   :  { %1894 = vmatprep.mubr.msk.bf16.mxu1 %vm1029_vm2, %v1178_v48  ;;  %v1156_v19 = vsel %vm1029_vm2, %v2061_v44, 0.0 }
 0x4eb   :  { %v2063_v18 = vpop.eup %2062  ;;  %1157 = vadd.xlane.f32.xlu0 %v1156_v19 }
 0x4ec   :  { %v1179_v46 = vpack.c.bf16 %v2063_v18, %v2061_v44  ;;  %v1159_v27 = vsel %vm1029_vm2, %v2063_v18, 0.0 }
 0x4ed   :  { %v2065_v50 = vpop.eup %2064  ;;  %1160 = vadd.xlane.f32.xlu1 %v1159_v27 }
 0x4ee   :  { %1895 = vmatmul.mubr.msk.bf16.vlgmr.msra.gmra.mrb[36].mxu1 %vm1029_vm2, %v1179_v46  ;;  %v1162_v32 = vsel %vm1029_vm2, %v2065_v50, 0.0 }
 0x4ef   :  { %v2067_v59 = vpop.eup %2066  ;;  %1163 = vadd.xlane.f32.xlu0 %v1162_v32 }
 0x4f0   :  { %v1165_v61 = vsel %vm1029_vm2, %v2067_v59, 0.0  ;;  %v1180_v62 = vpack.c.bf16 %v2067_v59, %v2065_v50 }
 0x4f1   :  { %v2069_v63 = vpop.eup %2068  ;;  %1166 = vadd.xlane.f32.xlu1 %v1165_v61 }
 0x4f2   :  { %1898 = vmatprep.mubr.msk.bf16.mxu1 %vm1029_vm2, %v1180_v62  ;;  %v1168_v35 = vsel %vm1029_vm2, %v2069_v63, 0.0 }
 0x4f3   :  { %v2071_v33 = vpop.eup %2070  ;;  %1169 = vadd.xlane.f32.xlu0 %v1168_v35 }
 0x4f4   :  { %v1171_v43 = vsel %vm1029_vm2, %v2071_v33, 0.0  ;;  %v1181_v2 = vpack.c.bf16 %v2071_v33, %v2069_v63 }
 0x4f5   :  { %1172 = vadd.xlane.f32.xlu1 %v1171_v43 }
 0x4f6   :  { %1899 = vmatmul.mubr.msk.bf16.gmra.mrb[40].mxu1 %vm1029_vm2, %v1181_v2 }
 0x554   :  { %v1128_v60 = vpop.xlane.xlu0 %1127 }
 0x555   :  { %2072 = vrcp.f32 %v1128_v60 }
 0x558   :  { %v1131_v9 = vpop.xlane.xlu1 %1130  ;;  %v1134_v1 = vpop.xlane.xlu0 %1133 }
 0x559   :  { %2074 = vrcp.f32 %v1134_v1 }
 0x55c   :  { %v1140_v24 = vpop.xlane.xlu0 %1139 }
 0x55d   :  { %v1137_v15 = vpop.xlane.xlu1 %1136 }
 0x55e   :  { %2076 = vrcp.f32 %v1137_v15 }
 0x55f   :  { %2078 = vrcp.f32 %v1131_v9  ;;  %v2073_v38 = vpop.eup %2072 }
 0x560   :  { %v1146_v0 = vpop.xlane.xlu0 %1145  ;;  %2080 = vrcp.f32 %v1140_v24 }
 0x561   :  { %v1143_v16 = vpop.xlane.xlu1 %1142  ;;  %2082 = vrcp.f32 %v1146_v0 }
 0x563   :  { %v2075_v42 = vpop.eup %2074 }
 0x565   :  { %v1149_v37 = vpop.xlane.xlu1 %1148 }
 0x566   :  { %2084 = vrcp.f32 %v1149_v37 }
 0x567   :  { %2086 = vrcp.f32 %v1143_v16 }
 0x568   :  { %v2077_v25 = vpop.eup %2076 }
 0x569   :  { %v2079_v20 = vpop.eup %2078 }
 0x56a   :  { %v2081_v41 = vpop.eup %2080 }
 0x56b   :  { %v2083_v22 = vpop.eup %2082 }
 0x570   :  { %v2085_v53 = vpop.eup %2084 }
 0x571   :  { %v2087_v56 = vpop.eup %2086 }
 0x574   :  { %v1152_v51 = vpop.xlane.xlu0 %1151 }
 0x575   :  { %2088 = vrcp.f32 %v1152_v51 }
 0x576   :  { %v1155_v49 = vpop.xlane.xlu1 %1154 }
 0x578   :  { %v1158_v57 = vpop.xlane.xlu0 %1157 }
 0x579   :  { %2090 = vrcp.f32 %v1158_v57 }
 0x57a   :  { %v1161_v34 = vpop.xlane.xlu1 %1160 }
 0x57b   :  { %2092 = vrcp.f32 %v1161_v34  ;;  %v2111_v34 = vld [vmem:[#allocation2 + $0x28] sm:$0xff] }
 0x57c   :  { %v1164_v48 = vpop.xlane.xlu0 %1163  ;;  %2094 = vrcp.f32 %v1155_v49 }
 0x57d   :  { %2096 = vrcp.f32 %v1164_v48 }
 0x57e   :  { %v1167_v44 = vpop.xlane.xlu1 %1166 }
 0x57f   :  { %v2089_v46 = vpop.eup %2088 }
 0x580   :  { %v1170_v19 = vpop.xlane.xlu0 %1169 }
 0x581   :  { %2098 = vrcp.f32 %v1170_v19 }
 0x582   :  { %v1173_v18 = vpop.xlane.xlu1 %1172 }
 0x583   :  { %2100 = vrcp.f32 %v1173_v18  ;;  %v2091_v50 = vpop.eup %2090 }
 0x584   :  { %2102 = vrcp.f32 %v1167_v44 }
 0x585   :  { %v2093_v59 = vpop.eup %2092 }
 0x586   :  { %v2095_v62 = vpop.eup %2094 }
 0x587   :  { %v2097_v58 = vpop.eup %2096 }
 0x58b   :  { %v2099_v23 = vpop.eup %2098 }
 0x58d   :  { %v2101_v14 = vpop.eup %2100 }
 0x58e   :  { %v2103_v60 = vpop.eup %2102 }
 0x5a0   :  { %v1880_v6 = vpop.f32.mrb[28].mxu1 }
 0x5a1   :  { %v1228_v26 = vpop.f32.mrb[29].mxu1  ;;  %v1354_v45 = vmul.f32 %v2075_v42, %v1880_v6 }
 0x5a2   :  { %v1881_v4 = vpop.f32.mrb[30].mxu1  ;;  %v1352_v5 = vmul.f32 %v2073_v38, %v1228_v26  ;;  %v2794_v38 = vld [vmem:[%s2834_s7] ss:$0 sm:$0xff]  ;;  %s2253_s7 = smov [#allocation10]  }
 0x5a3   :  { %v1355_v10 = vmul.f32 %v2077_v25, %v1881_v4  ;;  %v1231_v12 = vpop.f32.mrb[31].mxu1  ;;  %s1581_s20 = sshll.u32 %s2253_s7, 4  ;;  %s1582_s20 = int_to_ptr.vmem [resolvable:$true] %s1581_s20 }
 0x5a4   :  { %v1353_v36 = vmul.f32 %v2079_v20, %v1231_v12  ;;  %v2104_v20 = vld [vmem:[#allocation2 + $0x10] sm:$0xff]  ;;  %s2208_s0 = scalar_lea.vmem %s1582_s20, 2048  ;;  %p2213_p5 = scmp.lt.s32.totalorder %s1582_s20, %s1582_s20 }
 0x5a5   :  { %v1369_v40 = vpack.c.bf16 %v1355_v10, %v1354_v45  ;;  %p2209_p4 = scmp.ne.s32.totalorder %s1582_s20, %s2208_s0  ;;  %p2214_p6 = scmp.lt.s32.totalorder %s2208_s0, %s2208_s0 }
 0x5a6   :  { %v1368_v30 = vpack.c.bf16 %v1353_v36, %v1352_v5  ;;  %v2105_v5 = vld [vmem:[#allocation2] sm:$0xff] }
 0x5a7   :  { %p2215_p7 = por %p2214_p6, %p2213_p5 }
 0x5a8   :  { %1918 = vmatprep.mubr.bf16.mxu0 %v1368_v30  ;;  %v2106_v30 = vld [vmem:[#allocation2 + $0x18] sm:$0xff] }
 0x5a9   :  { %1919 = vmatmul.mubr.bf16.vlgmr.msra.gmra.mrb[40].mxu0 %v1369_v40  ;;  %p2216_p8 = pnand %p2215_p7, %p2209_p4 }
 0x5aa   :  { %v1884_v7 = vpop.f32.mrb[32].mxu1 }
 0x5ab   :  { %v1244_v52 = vpop.f32.mrb[33].mxu1  ;;  %v1358_v29 = vmul.f32 %v2083_v22, %v1884_v7  ;;  %v2107_v7 = vld [vmem:[#allocation2 + $0x8] sm:$0xff] }
 0x5ac   :  { %v1885_v55 = vpop.f32.mrb[34].mxu1  ;;  %v1356_v17 = vmul.f32 %v2081_v41, %v1244_v52 }
 0x5ad   :  { %v1359_v31 = vmul.f32 %v2085_v53, %v1885_v55  ;;  %v1247_v47 = vpop.f32.mrb[35].mxu1 }
 0x5ae   :  { %v1357_v11 = vmul.f32 %v2087_v56, %v1247_v47  ;;  %v2108_v56 = vld [vmem:[#allocation2 + $0x30] sm:$0xff] }
 0x5af   :  { %v1371_v28 = vpack.c.bf16 %v1359_v31, %v1358_v29 }
 0x5b0   :  { %v1370_v39 = vpack.c.bf16 %v1357_v11, %v1356_v17  ;;  %v2109_v17 = vld [vmem:[#allocation2 + $0x20] sm:$0xff] }
 0x5b2   :  { %1922 = vmatprep.mubr.bf16.mxu0 %v1370_v39  ;;  %v2110_v39 = vld [vmem:[#allocation2 + $0x38] sm:$0xff] }
 0x5b3   :  { %1923 = vmatmul.mubr.bf16.gmra.mrb[44].mxu0 %v1371_v28 }
 0x5c1   :  { %v1896_v27 = vpop.f32.mrb[36].mxu1 }
 0x5c2   :  { %v1305_v32 = vpop.f32.mrb[37].mxu1  ;;  %v1362_v63 = vmul.f32 %v2091_v50, %v1896_v27  ;;  %v2112_v50 = vld [vmem:[#allocation2 + $0x50] sm:$0xff] }
 0x5c3   :  { %v1897_v61 = vpop.f32.mrb[38].mxu1  ;;  %v1360_v43 = vmul.f32 %v2089_v46, %v1305_v32 }
 0x5c4   :  { %v1363_v35 = vmul.f32 %v2093_v59, %v1897_v61  ;;  %v1308_v33 = vpop.f32.mrb[39].mxu1 }
 0x5c5   :  { %v1361_v2 = vmul.f32 %v2095_v62, %v1308_v33  ;;  %v2113_v62 = vld [vmem:[#allocation2 + $0x40] sm:$0xff]  ;;  %v2114_v33 = vld [vmem:[#allocation2 + $0x58] sm:$0xff] }
 0x5c6   :  { %v1373_v3 = vpack.c.bf16 %v1363_v35, %v1362_v63 }
 0x5c7   :  { %v1372_v54 = vpack.c.bf16 %v1361_v2, %v1360_v43  ;;  %v2115_v2 = vld [vmem:[#allocation2 + $0x48] sm:$0xff] }
 0x5c9   :  { %v1900_v8 = vpop.f32.mrb[40].mxu1  ;;  %1926 = vmatprep.mubr.bf16.mxu0 %v1372_v54 }
 0x5ca   :  { %v1321_v13 = vpop.f32.mrb[41].mxu1  ;;  %1927 = vmatmul.mubr.bf16.gmra.mrb[48].mxu0 %v1373_v3  ;;  %v1366_v9 = vmul.f32 %v2099_v23, %v1900_v8 }
 0x5cb   :  { %v1901_v21 = vpop.f32.mrb[42].mxu1  ;;  %v1364_v24 = vmul.f32 %v2097_v58, %v1321_v13 }
 0x5cc   :  { %v1367_v1 = vmul.f32 %v2101_v14, %v1901_v21  ;;  %v1324_v15 = vpop.f32.mrb[43].mxu1  ;;  %v2116_v14 = vld [vmem:[#allocation2 + $0x70] sm:$0xff] }
 0x5cd   :  { %v1365_v16 = vmul.f32 %v2103_v60, %v1324_v15 }
 0x5ce   :  { %v1375_v0 = vpack.c.bf16 %v1367_v1, %v1366_v9  ;;  %v2117_v1 = vld [vmem:[#allocation2 + $0x60] sm:$0xff] }
 0x5cf   :  { %v1374_v37 = vpack.c.bf16 %v1365_v16, %v1364_v24  ;;  %v2118_v16 = vld [vmem:[#allocation2 + $0x78] sm:$0xff] }
 0x5d1   :  { %1930 = vmatprep.mubr.bf16.mxu0 %v1374_v37  ;;  %v2119_v37 = vld [vmem:[#allocation2 + $0x68] sm:$0xff] }
 0x5d2   :  { %1931 = vmatmul.mubr.bf16.gmra.mrb[52].mxu0 %v1375_v0 }
 0x67c   :  { %v1920_v6 = vpop.f32.mrb[40].mxu0 }
 0x67d   :  { %v1490_v42 = vadd.f32 %v1920_v6, %v2794_v38  ;;  %v1481_v26 = vpop.f32.mrb[41].mxu0 }
 0x67e   :  { %v1482_v25 = vadd.f32 %v2794_v38, %v1481_v26  ;;  %v1921_v4 = vpop.f32.mrb[42].mxu0 }
 0x67f   :  { %v1546_v45 = vadd.f32 %v2104_v20, %v1490_v42  ;;  %v1493_v10 = vadd.f32 %v1921_v4, %v2794_v38  ;;  %v1484_v12 = vpop.f32.mrb[43].mxu0 }
 0x680   :  { %v1544_v36 = vadd.f32 %v2105_v5, %v1482_v25  ;;  %v1485_v40 = vadd.f32 %v2794_v38, %v1484_v12 }
 0x681   :  { %1562 = vst [vmem:[#allocation10 + $0x10] sm:$0xff] %v1546_v45  ;;  %v1547_v41 = vadd.f32 %v2106_v30, %v1493_v10 }
 0x682   :  { %1560 = vst [vmem:[#allocation10] sm:$0xff] %v1544_v36  ;;  %v1545_v22 = vadd.f32 %v2107_v7, %v1485_v40 }
 0x683   :  { %1563 = vst [vmem:[#allocation10 + $0x18] sm:$0xff] %v1547_v41 }
 0x684   :  { %1561 = vst [vmem:[#allocation10 + $0x8] sm:$0xff] %v1545_v22 }
 0x686   :  { %v1924_v51 = vpop.f32.mrb[44].mxu0 }
 0x687   :  { %v1506_v52 = vadd.f32 %v1924_v51, %v2794_v38  ;;  %v1497_v53 = vpop.f32.mrb[45].mxu0 }
 0x688   :  { %v1498_v49 = vadd.f32 %v2794_v38, %v1497_v53  ;;  %v1925_v55 = vpop.f32.mrb[46].mxu0 }
 0x689   :  { %v1550_v29 = vadd.f32 %v2108_v56, %v1506_v52  ;;  %v1509_v31 = vadd.f32 %v1925_v55, %v2794_v38  ;;  %v1500_v47 = vpop.f32.mrb[47].mxu0 }
 0x68a   :  { %v1548_v11 = vadd.f32 %v2109_v17, %v1498_v49  ;;  %v1501_v28 = vadd.f32 %v2794_v38, %v1500_v47 }
 0x68b   :  { %1566 = vst [vmem:[#allocation10 + $0x30] sm:$0xff] %v1550_v29  ;;  %v1551_v57 = vadd.f32 %v2110_v39, %v1509_v31 }
 0x68c   :  { %1564 = vst [vmem:[#allocation10 + $0x20] sm:$0xff] %v1548_v11  ;;  %v1549_v48 = vadd.f32 %v2111_v34, %v1501_v28 }
 0x68d   :  { %1567 = vst [vmem:[#allocation10 + $0x38] sm:$0xff] %v1551_v57 }
 0x68e   :  { %1565 = vst [vmem:[#allocation10 + $0x28] sm:$0xff] %v1549_v48 }
 0x69d   :  { %v1928_v44 = vpop.f32.mrb[48].mxu0 }
 0x69e   :  { %v1522_v19 = vadd.f32 %v1928_v44, %v2794_v38  ;;  %v1513_v18 = vpop.f32.mrb[49].mxu0 }
 0x69f   :  { %v1514_v46 = vadd.f32 %v2794_v38, %v1513_v18  ;;  %v1929_v27 = vpop.f32.mrb[50].mxu0 }
 0x6a0   :  { %v1554_v32 = vadd.f32 %v2112_v50, %v1522_v19  ;;  %v1525_v59 = vadd.f32 %v1929_v27, %v2794_v38  ;;  %v1516_v61 = vpop.f32.mrb[51].mxu0 }
 0x6a1   :  { %v1552_v63 = vadd.f32 %v2113_v62, %v1514_v46  ;;  %v1517_v35 = vadd.f32 %v2794_v38, %v1516_v61 }
 0x6a2   :  { %1570 = vst [vmem:[#allocation10 + $0x50] sm:$0xff] %v1554_v32  ;;  %v1555_v43 = vadd.f32 %v2114_v33, %v1525_v59 }
 0x6a3   :  { %1568 = vst [vmem:[#allocation10 + $0x40] sm:$0xff] %v1552_v63  ;;  %v1553_v3 = vadd.f32 %v2115_v2, %v1517_v35 }
 0x6a4   :  { %1571 = vst [vmem:[#allocation10 + $0x58] sm:$0xff] %v1555_v43 }
 0x6a5   :  { %1569 = vst [vmem:[#allocation10 + $0x48] sm:$0xff] %v1553_v3  ;;  %v1932_v54 = vpop.f32.mrb[52].mxu0 }
 0x6a6   :  { %v1538_v58 = vadd.f32 %v1932_v54, %v2794_v38  ;;  %v1529_v8 = vpop.f32.mrb[53].mxu0 }
 0x6a7   :  { %v1530_v23 = vadd.f32 %v2794_v38, %v1529_v8  ;;  %v1933_v13 = vpop.f32.mrb[54].mxu0 }
 0x6a8   :  { %v1558_v21 = vadd.f32 %v2116_v14, %v1538_v58  ;;  %v1541_v60 = vadd.f32 %v1933_v13, %v2794_v38  ;;  %v1532_v9 = vpop.f32.mrb[55].mxu0 }
 0x6a9   :  { %v1556_v15 = vadd.f32 %v2117_v1, %v1530_v23  ;;  %v1533_v24 = vadd.f32 %v2794_v38, %v1532_v9 }
 0x6aa   :  { %1574 = vst [vmem:[#allocation10 + $0x70] sm:$0xff] %v1558_v21  ;;  %v1559_v0 = vadd.f32 %v2118_v16, %v1541_v60 }
 0x6ab   :  { %1572 = vst [vmem:[#allocation10 + $0x60] sm:$0xff] %v1556_v15  ;;  %v1557_v6 = vadd.f32 %v2119_v37, %v1533_v24 }
 0x6ac   :  { %1575 = vst [vmem:[#allocation10 + $0x78] sm:$0xff] %v1559_v0 }
 0x6ad   :  { %1573 = vst [vmem:[#allocation10 + $0x68] sm:$0xff] %v1557_v6 }
 0x6ae   :  { %2219 = shalt.err (!%p2216_p8)
}
 0x6af   :  { %s2220_s22 = scalar_lea.hbm %s2835_s8, 2048 }
 0x6b0   :  { %p2221_p9 = scmp.ne.s32.totalorder %s2835_s8, %s2220_s22  ;;  %p2224_p10 = scmp.lt.u32.totalorder %s2220_s22, %s2835_s8 }
 0x6b2   :  { %p2226_p11 = pnand %p2224_p10, %p2221_p9 }
 0x6b4   :  { %2229 = shalt.err (!%p2226_p11)
}
 0x6b5   :  { %1587 = dma.vmem_to_hbm [thread:$0]  %s1582_s20, 2048, %s2835_s8, [#allocation4], %s2240_s17, %s2240_s17, %s2241_s18  }
 0x6b6   :  { %2236 = dma.done.wait [#allocation4], 2048  }
 0x6b7   :  { %2237 = vsyncadd [#allocation4], 4294965248 }
 0x6b8   :  { %1591 = vsyncpa [#allocation3], 1 }
 0x6b9   :  { %1592 = vsyncpa [#allocation6], 1 }
 0x6ba   :  { %1593 = vsyncpa [#allocation9], 1 }
 0x6bb   :  { %1594 = vsyncpa [#allocation4], 1 }

</bundles_post_ra>
